<compile_context>
chip_gen: v7x
topology: tpu7x:2x2x1
jax: 0.10.0
libtpu: 0.0.40
codegen_flags: <defaults>
</compile_context>

<pallas_src>
import jax
import jax.numpy as jnp
from jax import lax
from jax.experimental import pallas as pl
from jax.experimental.pallas import tpu as pltpu

NUM_CLASSES = 30                       # num_classes in the PyTorch script
EMBED = 128                            # nn.Embedding(len(uniquewords), 128)
HIDDEN = 128                           # nn.LSTM(input_size=128, hidden_size=128)
FC1 = 256                              # nn.Linear(128, 256)
OUT_PAD = 128                          # classifier output padded to lane width
VOCAB = 50                             # synthetic stand-in for len(uniquewords)
VOCAB_PAD = ((VOCAB + 15) // 16) * 16  # bf16 sublane-tile padded vocab (64)
MAX_CHUNK = 64                         # timesteps per grid step


def make_net2_kernel(T, chunk, B):
    """T = real seq length, chunk = timesteps per grid step, B = padded batch."""
    H = HIDDEN
    N = chunk * B
    needs_mask = (T % chunk) != 0       # static: only emit masking if T is padded

    def net2_kernel(tok_ref, table_ref, whh_ref, w1_ref, b1_ref, w2_ref, b2_ref,
                    out_ref, xg_ref, h_ref, c_ref):
        ci = pl.program_id(0)

        @pl.when(ci == 0)
        def _():
            h_ref[...] = jnp.zeros_like(h_ref)
            c_ref[...] = jnp.zeros_like(c_ref)

        # --- In-kernel embedding gather: one-hot(tokens) @ gate_table picks the
        #     precomputed  x_t @ W_ih + (b_ih + b_hh)  row for every (t, b).
        #     Exact row selection (one-hot is exact in bf16), stored as bf16.
        tok = tok_ref[...]                                          # (chunk*B, 1) i32
        vocab_iota = lax.broadcasted_iota(jnp.int32, (N, VOCAB_PAD), 1)
        onehot = (tok == vocab_iota).astype(jnp.bfloat16)           # (chunk*B, VOCAB_PAD)
        xg_ref[...] = jnp.dot(onehot, table_ref[...],
                              preferred_element_type=jnp.float32).astype(xg_ref.dtype)

        def step(t, carry):
            h, c = carry                                            # f32 (B, H) each
            base = pl.multiple_of(t * B, B)                         # bf16-tile aligned
            g_in = xg_ref[pl.ds(base, B), :].astype(jnp.float32)    # (B, 4H)
            # TODO(synk): keep W_hh resident in MXU weight registers via
            # pltpu.matmul_push_rhs / matmul_acc_lhs to cut per-step latency.
            gates = g_in + jnp.dot(h.astype(whh_ref.dtype), whh_ref[...],
                                   preferred_element_type=jnp.float32)
            # PyTorch LSTM gate order: i, f, g, o (128-aligned slices)
            i_g = jax.nn.sigmoid(gates[:, 0 * H:1 * H])
            f_g = jax.nn.sigmoid(gates[:, 1 * H:2 * H])
            g_g = jnp.tanh(gates[:, 2 * H:3 * H])
            o_g = jax.nn.sigmoid(gates[:, 3 * H:4 * H])
            c_new = f_g * c + i_g * g_g
            h_new = o_g * jnp.tanh(c_new)
            if needs_mask:
                keep = (ci * chunk + t) < T                         # mask padded steps
                h_new = jnp.where(keep, h_new, h)
                c_new = jnp.where(keep, c_new, c)
            return (h_new, c_new)

        h_last, c_last = lax.fori_loop(
            0, chunk, step, (h_ref[...], c_ref[...]),
            unroll=True if chunk <= 32 else 8)                      # capped unroll
        h_ref[...] = h_last
        c_ref[...] = c_last

        # --- MLP head on the final hidden state (== output[:, -1, :]), last chunk only.
        @pl.when(ci == pl.num_programs(0) - 1)
        def _():
            x = jnp.dot(h_last.astype(w1_ref.dtype), w1_ref[...],
                        preferred_element_type=jnp.float32) + b1_ref[...]
            x = jnp.maximum(x, 0.0)                                 # ReLU
            x = jnp.dot(x.astype(w2_ref.dtype), w2_ref[...],
                        preferred_element_type=jnp.float32) + b2_ref[...]
            out_ref[...] = jax.nn.sigmoid(x).astype(out_ref.dtype)  # lane-dense (B,128)

    return net2_kernel


def net2_forward(inp, params):
    B, T = inp.shape
    # Batch padded to a multiple of 16 (bf16 sublane tile) so xg slices stay aligned.
    # Biggest throughput lever remains packing more sequences per call (MXU rows).
    B_pad = max(16, ((B + 15) // 16) * 16)
    chunk = T if T <= MAX_CHUNK else MAX_CHUNK
    nchunks = (T + chunk - 1) // chunk
    T_pad = nchunks * chunk

    # Only tiny int32 token ids cross the boundary (time-major, padded with id 0).
    tok_tm = jnp.zeros((T_pad, B_pad), jnp.int32).at[:T, :B].set(inp.T.astype(jnp.int32))
    tok_flat = tok_tm.reshape(T_pad * B_pad, 1)

    table = params["gate_table"]
    args = (tok_flat, table, params["w_hh_t"], params["w1_t"], params["b1"],
            params["w2_t_pad"], params["b2_pad"])

    def nbytes(a):
        return a.size * a.dtype.itemsize

    # VMEM budget sized from the actual buffers, with headroom; capped for v7x.
    vmem_need = (
        2 * chunk * B_pad * 4                      # token block (double-buffered)
        + 2 * sum(nbytes(a) for a in args[1:])     # resident table + weights
        + chunk * B_pad * 4 * HIDDEN * 2           # bf16 xg scratch
        + 2 * B_pad * HIDDEN * 4                   # h, c scratch
        + 2 * B_pad * OUT_PAD * 4                  # output block
    )
    vmem_limit = int(min(48 << 20, max(8 << 20, 2 * vmem_need)))

    grid_spec = pltpu.PrefetchScalarGridSpec(
        num_scalar_prefetch=0,
        grid=(nchunks,),
        in_specs=[
            pl.BlockSpec((chunk * B_pad, 1), lambda i: (i, 0)),     # token chunk
            pl.BlockSpec(table.shape, lambda i: (0, 0)),            # gate table
            pl.BlockSpec(params["w_hh_t"].shape, lambda i: (0, 0)),
            pl.BlockSpec(params["w1_t"].shape, lambda i: (0, 0)),
            pl.BlockSpec(params["b1"].shape, lambda i: (0, 0)),
            pl.BlockSpec(params["w2_t_pad"].shape, lambda i: (0, 0)),
            pl.BlockSpec(params["b2_pad"].shape, lambda i: (0, 0)),
        ],
        out_specs=pl.BlockSpec((B_pad, OUT_PAD), lambda i: (0, 0)),
        scratch_shapes=[
            pltpu.VMEM((chunk * B_pad, 4 * HIDDEN), jnp.bfloat16),  # per-chunk gates
            pltpu.VMEM((B_pad, HIDDEN), jnp.float32),               # h (persistent)
            pltpu.VMEM((B_pad, HIDDEN), jnp.float32),               # c (persistent)
        ],
    )

    out_pad = pl.pallas_call(
        make_net2_kernel(T=T, chunk=chunk, B=B_pad),
        out_shape=jax.ShapeDtypeStruct((B_pad, OUT_PAD), jnp.float32),
        grid_spec=grid_spec,
        compiler_params=pltpu.CompilerParams(
            dimension_semantics=("arbitrary",),                     # serial recurrence
            vmem_limit_bytes=vmem_limit),
    )(*args)
    return out_pad[:B, :NUM_CLASSES]


def init_params(key):
    ks = jax.random.split(key, 7)
    s_lstm = 1.0 / jnp.sqrt(HIDDEN)
    s_fc1 = 1.0 / jnp.sqrt(HIDDEN)
    s_fc2 = 1.0 / jnp.sqrt(FC1)

    emb = jax.random.normal(ks[0], (VOCAB, EMBED), jnp.float32)
    w_ih = jax.random.uniform(ks[1], (4 * HIDDEN, EMBED), jnp.float32, -s_lstm, s_lstm)
    w_hh = jax.random.uniform(ks[2], (4 * HIDDEN, HIDDEN), jnp.float32, -s_lstm, s_lstm)
    b_ih = jax.random.uniform(ks[3], (4 * HIDDEN,), jnp.float32, -s_lstm, s_lstm)
    b_hh = jax.random.uniform(ks[4], (4 * HIDDEN,), jnp.float32, -s_lstm, s_lstm)
    w1 = jax.random.uniform(ks[5], (FC1, HIDDEN), jnp.float32, -s_fc1, s_fc1)
    b1 = jnp.zeros((FC1,), jnp.float32)
    w2 = jax.random.uniform(ks[6], (NUM_CLASSES, FC1), jnp.float32, -s_fc2, s_fc2)
    b2 = jnp.zeros((NUM_CLASSES,), jnp.float32)

    # Offline precompute: per-token LSTM input gates  E @ W_ih.T + (b_ih + b_hh).
    # (Small vocab => ~100 KB; for very large vocabs this tradeoff reverses.)
    gate_f32 = emb @ w_ih.T + (b_ih + b_hh)[None, :]                # (VOCAB, 4H)
    gate_table = (jnp.zeros((VOCAB_PAD, 4 * HIDDEN), jnp.float32)
                  .at[:VOCAB, :].set(gate_f32)).astype(jnp.bfloat16)

    # Pad classifier weight/bias to a lane-dense 128-wide output.
    w2_t_pad = jnp.zeros((FC1, OUT_PAD), jnp.float32).at[:, :NUM_CLASSES].set(w2.T)
    b2_pad = jnp.zeros((1, OUT_PAD), jnp.float32).at[:, :NUM_CLASSES].set(b2[None, :])

    return {
        # f32 master copies (used by the pure-JAX reference)
        "embedding": emb,
        "w_ih_f32": w_ih, "w_hh_f32": w_hh, "b_ih": b_ih, "b_hh": b_hh,
        "w1_f32": w1, "b1_f32": b1, "w2_f32": w2, "b2_f32": b2,
        # kernel-ready: precomputed gate table, (in,out) layout bf16 weights,
        # f32 biases, lane-dense padded head
        "gate_table": gate_table,                   # (VOCAB_PAD, 512) bf16
        "w_hh_t": w_hh.T.astype(jnp.bfloat16),      # (128, 512)
        "w1_t": w1.T.astype(jnp.bfloat16),          # (128, 256)
        "b1": b1[None, :],                          # (1, 256) f32
        "w2_t_pad": w2_t_pad.astype(jnp.bfloat16),  # (256, 128) zero-padded
        "b2_pad": b2_pad,                           # (1, 128) f32 zero-padded
    }


def net2_reference(inp, params):
    """Pure-JAX f32 reference matching the PyTorch forward (for tolerance check)."""
    e = params["embedding"][inp]                                    # (B, T, 128)
    B, T, H = e.shape
    w_ih_t, w_hh_t = params["w_ih_f32"].T, params["w_hh_f32"].T
    b = (params["b_ih"] + params["b_hh"])[None, :]

    def step(carry, x_t):
        h, c = carry
        g = x_t @ w_ih_t + h @ w_hh_t + b
        i_g = jax.nn.sigmoid(g[:, 0 * H:1 * H])
        f_g = jax.nn.sigmoid(g[:, 1 * H:2 * H])
        g_g = jnp.tanh(g[:, 2 * H:3 * H])
        o_g = jax.nn.sigmoid(g[:, 3 * H:4 * H])
        c_new = f_g * c + i_g * g_g
        h_new = o_g * jnp.tanh(c_new)
        return (h_new, c_new), None

    (h_last, _), _ = lax.scan(step, (jnp.zeros((B, H)), jnp.zeros((B, H))),
                              jnp.transpose(e, (1, 0, 2)))
    x = jnp.maximum(h_last @ params["w1_f32"].T + params["b1_f32"], 0.0)
    return jax.nn.sigmoid(x @ params["w2_f32"].T + params["b2_f32"])


if __name__ == "__main__":
    key = jax.random.PRNGKey(0)
    pkey, ikey = jax.random.split(key)
    params = init_params(pkey)

    B, T = 2, 8
    inp = jax.random.randint(ikey, (B, T), 0, VOCAB, dtype=jnp.int32)

    out = net2_forward(inp, params)
    out = jax.block_until_ready(out)

    assert out.shape == (B, NUM_CLASSES)
    assert bool(jnp.all(jnp.isfinite(out)))
    assert bool(jnp.all((out >= 0.0) & (out <= 1.0)))               # sigmoid range

    ref = net2_reference(inp, params)                               # bf16-vs-f32 tolerance
    assert bool(jnp.allclose(out, ref, atol=2e-2, rtol=2e-2))

    print("KERNEL_OK")
</pallas_src>

<mosaic_0001>
module attributes {stable_mosaic.version = 11 : i64} {
  func.func @net2_kernel(%arg0: i32, %arg1: memref<128x1xi32, #tpu.memory_space<vmem>>, %arg2: memref<64x512xbf16, #tpu.memory_space<vmem>>, %arg3: memref<128x512xbf16, #tpu.memory_space<vmem>>, %arg4: memref<128x256xbf16, #tpu.memory_space<vmem>>, %arg5: memref<1x256xf32, #tpu.memory_space<vmem>>, %arg6: memref<256x128xbf16, #tpu.memory_space<vmem>>, %arg7: memref<1x128xf32, #tpu.memory_space<vmem>>, %arg8: memref<16x128xf32, #tpu.memory_space<vmem>>, %arg9: memref<128x512xbf16, #tpu.memory_space<vmem>>, %arg10: memref<16x128xf32, #tpu.memory_space<vmem>>, %arg11: memref<16x128xf32, #tpu.memory_space<vmem>>) attributes {dimension_semantics = [#tpu.dimension_semantics<arbitrary>], iteration_bounds = array<i64: 1>, scalar_prefetch = 0 : i64, scratch_operands = 3 : i64, tpu.core_type = #tpu.core_type<tc>, window_params = [{transform_indices = @transform_0, window_bounds = array<i64: 128, 1>}, {pipeline_mode = #tpu.pipeline_mode<synchronous>, transform_indices = @transform_1, window_bounds = array<i64: 64, 512>}, {pipeline_mode = #tpu.pipeline_mode<synchronous>, transform_indices = @transform_2, window_bounds = array<i64: 128, 512>}, {pipeline_mode = #tpu.pipeline_mode<synchronous>, transform_indices = @transform_3, window_bounds = array<i64: 128, 256>}, {pipeline_mode = #tpu.pipeline_mode<synchronous>, transform_indices = @transform_4, window_bounds = array<i64: 1, 256>}, {pipeline_mode = #tpu.pipeline_mode<synchronous>, transform_indices = @transform_5, window_bounds = array<i64: 256, 128>}, {pipeline_mode = #tpu.pipeline_mode<synchronous>, transform_indices = @transform_6, window_bounds = array<i64: 1, 128>}, {pipeline_mode = #tpu.pipeline_mode<synchronous>, transform_indices = @transform_7, window_bounds = array<i64: 16, 128>}]} {
    %c0_i32 = arith.constant 0 : i32
    %0 = arith.cmpi eq, %arg0, %c0_i32 : i32
    %1 = arith.extui %0 : i1 to i32
    %c0_i32_0 = arith.constant 0 : i32
    %2 = arith.cmpi ne, %1, %c0_i32_0 : i32
    scf.if %2 {
      %cst_80 = arith.constant 0.000000e+00 : f32
      %293 = vector.broadcast %cst_80 : f32 to vector<16x128xf32>
      %c0_81 = arith.constant 0 : index
      %c0_82 = arith.constant 0 : index
      %294 = vector.load %arg10[%c0_81, %c0_82] : memref<16x128xf32, #tpu.memory_space<vmem>>, vector<16x128xf32>
      tpu.vector_store %arg10[%c0_81, %c0_82], %293 {strides = array<i32>} : memref<16x128xf32, #tpu.memory_space<vmem>>, vector<16x128xf32>,
      %cst_83 = arith.constant 0.000000e+00 : f32
      %295 = vector.broadcast %cst_83 : f32 to vector<16x128xf32>
      %c0_84 = arith.constant 0 : index
      %c0_85 = arith.constant 0 : index
      %296 = vector.load %arg11[%c0_84, %c0_85] : memref<16x128xf32, #tpu.memory_space<vmem>>, vector<16x128xf32>
      tpu.vector_store %arg11[%c0_84, %c0_85], %295 {strides = array<i32>} : memref<16x128xf32, #tpu.memory_space<vmem>>, vector<16x128xf32>,
    } else {
    }
    %c0 = arith.constant 0 : index
    %c0_1 = arith.constant 0 : index
    %3 = vector.load %arg1[%c0, %c0_1] : memref<128x1xi32, #tpu.memory_space<vmem>>, vector<128x1xi32>
    %4 = tpu.iota {dimensions = array<i32: 1>} : vector<128x64xi32>
    %5 = vector.broadcast %3 : vector<128x1xi32> to vector<128x64xi32>
    %6 = arith.cmpi eq, %5, %4 : vector<128x64xi32>
    %7 = arith.extui %6 : vector<128x64xi1> to vector<128x64xi32>
    %8 = arith.sitofp %7 : vector<128x64xi32> to vector<128x64xf32>
    %9 = arith.truncf %8 : vector<128x64xf32> to vector<128x64xbf16>
    %c0_2 = arith.constant 0 : index
    %c0_3 = arith.constant 0 : index
    %10 = vector.load %arg2[%c0_2, %c0_3] : memref<64x512xbf16, #tpu.memory_space<vmem>>, vector<64x512xbf16>
    %cst = arith.constant dense<0.000000e+00> : vector<128x512xf32>
    %11 = tpu.matmul %9, %10, %cst {dimension_numbers = #tpu.dot_dimension_numbers<[1], [0], [0], [1], [0, 0, 1, 1], [], []>} : vector<128x64xbf16>, vector<64x512xbf16>, vector<128x512xf32> -> vector<128x512xf32>
    %12 = arith.truncf %11 : vector<128x512xf32> to vector<128x512xbf16>
    %c0_4 = arith.constant 0 : index
    %c0_5 = arith.constant 0 : index
    %13 = vector.load %arg9[%c0_4, %c0_5] : memref<128x512xbf16, #tpu.memory_space<vmem>>, vector<128x512xbf16>
    tpu.vector_store %arg9[%c0_4, %c0_5], %12 {strides = array<i32>} : memref<128x512xbf16, #tpu.memory_space<vmem>>, vector<128x512xbf16>,
    %c0_6 = arith.constant 0 : index
    %c0_7 = arith.constant 0 : index
    %14 = vector.load %arg10[%c0_6, %c0_7] : memref<16x128xf32, #tpu.memory_space<vmem>>, vector<16x128xf32>
    %c0_8 = arith.constant 0 : index
    %c0_9 = arith.constant 0 : index
    %15 = vector.load %arg11[%c0_8, %c0_9] : memref<16x128xf32, #tpu.memory_space<vmem>>, vector<16x128xf32>
    %c0_i32_10 = arith.constant 0 : i32
    %c16_i32 = arith.constant 16 : i32
    %16 = arith.muli %c0_i32_10, %c16_i32 : i32
    %17 = tpu.assume_multiple %16, 16 : i32
    %18 = arith.index_cast %17 : i32 to index
    %c0_11 = arith.constant 0 : index
    %19 = vector.load %arg9[%18, %c0_11] : memref<128x512xbf16, #tpu.memory_space<vmem>>, vector<16x512xbf16>
    %20 = arith.extf %19 : vector<16x512xbf16> to vector<16x512xf32>
    %21 = arith.truncf %14 : vector<16x128xf32> to vector<16x128xbf16>
    %c0_12 = arith.constant 0 : index
    %c0_13 = arith.constant 0 : index
    %22 = vector.load %arg3[%c0_12, %c0_13] : memref<128x512xbf16, #tpu.memory_space<vmem>>, vector<128x512xbf16>
    %cst_14 = arith.constant dense<0.000000e+00> : vector<16x512xf32>
    %23 = tpu.matmul %21, %22, %cst_14 {dimension_numbers = #tpu.dot_dimension_numbers<[1], [0], [0], [1], [0, 0, 1, 1], [], []>} : vector<16x128xbf16>, vector<128x512xbf16>, vector<16x512xf32> -> vector<16x512xf32>
    %24 = arith.addf %20, %23 : vector<16x512xf32>
    %25 = vector.extract_strided_slice %24 {offsets = [0, 0], sizes = [16, 128], strides = [1, 1]} : vector<16x512xf32> to vector<16x128xf32>
    %26 = arith.negf %25 : vector<16x128xf32>
    %27 = math.exp %26 : vector<16x128xf32>
    %cst_15 = arith.constant 1.000000e+00 : f32
    %28 = vector.broadcast %cst_15 : f32 to vector<16x128xf32>
    %29 = arith.addf %28, %27 : vector<16x128xf32>
    %30 = arith.divf %28, %29 : vector<16x128xf32>
    %31 = vector.extract_strided_slice %24 {offsets = [0, 128], sizes = [16, 128], strides = [1, 1]} : vector<16x512xf32> to vector<16x128xf32>
    %32 = arith.negf %31 : vector<16x128xf32>
    %33 = math.exp %32 : vector<16x128xf32>
    %cst_16 = arith.constant 1.000000e+00 : f32
    %34 = vector.broadcast %cst_16 : f32 to vector<16x128xf32>
    %35 = arith.addf %34, %33 : vector<16x128xf32>
    %36 = arith.divf %34, %35 : vector<16x128xf32>
    %37 = vector.extract_strided_slice %24 {offsets = [0, 256], sizes = [16, 128], strides = [1, 1]} : vector<16x512xf32> to vector<16x128xf32>
    %38 = math.tanh %37 : vector<16x128xf32>
    %39 = vector.extract_strided_slice %24 {offsets = [0, 384], sizes = [16, 128], strides = [1, 1]} : vector<16x512xf32> to vector<16x128xf32>
    %40 = arith.negf %39 : vector<16x128xf32>
    %41 = math.exp %40 : vector<16x128xf32>
    %cst_17 = arith.constant 1.000000e+00 : f32
    %42 = vector.broadcast %cst_17 : f32 to vector<16x128xf32>
    %43 = arith.addf %42, %41 : vector<16x128xf32>
    %44 = arith.divf %42, %43 : vector<16x128xf32>
    %45 = arith.mulf %36, %15 : vector<16x128xf32>
    %46 = arith.mulf %30, %38 : vector<16x128xf32>
    %47 = arith.addf %45, %46 : vector<16x128xf32>
    %48 = math.tanh %47 : vector<16x128xf32>
    %49 = arith.mulf %44, %48 : vector<16x128xf32>
    %c1_i32 = arith.constant 1 : i32
    %c16_i32_18 = arith.constant 16 : i32
    %50 = arith.muli %c1_i32, %c16_i32_18 : i32
    %51 = tpu.assume_multiple %50, 16 : i32
    %52 = arith.index_cast %51 : i32 to index
    %c0_19 = arith.constant 0 : index
    %53 = vector.load %arg9[%52, %c0_19] : memref<128x512xbf16, #tpu.memory_space<vmem>>, vector<16x512xbf16>
    %54 = arith.extf %53 : vector<16x512xbf16> to vector<16x512xf32>
    %55 = arith.truncf %49 : vector<16x128xf32> to vector<16x128xbf16>
    %c0_20 = arith.constant 0 : index
    %c0_21 = arith.constant 0 : index
    %56 = vector.load %arg3[%c0_20, %c0_21] : memref<128x512xbf16, #tpu.memory_space<vmem>>, vector<128x512xbf16>
    %cst_22 = arith.constant dense<0.000000e+00> : vector<16x512xf32>
    %57 = tpu.matmul %55, %56, %cst_22 {dimension_numbers = #tpu.dot_dimension_numbers<[1], [0], [0], [1], [0, 0, 1, 1], [], []>} : vector<16x128xbf16>, vector<128x512xbf16>, vector<16x512xf32> -> vector<16x512xf32>
    %58 = arith.addf %54, %57 : vector<16x512xf32>
    %59 = vector.extract_strided_slice %58 {offsets = [0, 0], sizes = [16, 128], strides = [1, 1]} : vector<16x512xf32> to vector<16x128xf32>
    %60 = arith.negf %59 : vector<16x128xf32>
    %61 = math.exp %60 : vector<16x128xf32>
    %cst_23 = arith.constant 1.000000e+00 : f32
    %62 = vector.broadcast %cst_23 : f32 to vector<16x128xf32>
    %63 = arith.addf %62, %61 : vector<16x128xf32>
    %64 = arith.divf %62, %63 : vector<16x128xf32>
    %65 = vector.extract_strided_slice %58 {offsets = [0, 128], sizes = [16, 128], strides = [1, 1]} : vector<16x512xf32> to vector<16x128xf32>
    %66 = arith.negf %65 : vector<16x128xf32>
    %67 = math.exp %66 : vector<16x128xf32>
    %cst_24 = arith.constant 1.000000e+00 : f32
    %68 = vector.broadcast %cst_24 : f32 to vector<16x128xf32>
    %69 = arith.addf %68, %67 : vector<16x128xf32>
    %70 = arith.divf %68, %69 : vector<16x128xf32>
    %71 = vector.extract_strided_slice %58 {offsets = [0, 256], sizes = [16, 128], strides = [1, 1]} : vector<16x512xf32> to vector<16x128xf32>
    %72 = math.tanh %71 : vector<16x128xf32>
    %73 = vector.extract_strided_slice %58 {offsets = [0, 384], sizes = [16, 128], strides = [1, 1]} : vector<16x512xf32> to vector<16x128xf32>
    %74 = arith.negf %73 : vector<16x128xf32>
    %75 = math.exp %74 : vector<16x128xf32>
    %cst_25 = arith.constant 1.000000e+00 : f32
    %76 = vector.broadcast %cst_25 : f32 to vector<16x128xf32>
    %77 = arith.addf %76, %75 : vector<16x128xf32>
    %78 = arith.divf %76, %77 : vector<16x128xf32>
    %79 = arith.mulf %70, %47 : vector<16x128xf32>
    %80 = arith.mulf %64, %72 : vector<16x128xf32>
    %81 = arith.addf %79, %80 : vector<16x128xf32>
    %82 = math.tanh %81 : vector<16x128xf32>
    %83 = arith.mulf %78, %82 : vector<16x128xf32>
    %c2_i32 = arith.constant 2 : i32
    %c16_i32_26 = arith.constant 16 : i32
    %84 = arith.muli %c2_i32, %c16_i32_26 : i32
    %85 = tpu.assume_multiple %84, 16 : i32
    %86 = arith.index_cast %85 : i32 to index
    %c0_27 = arith.constant 0 : index
    %87 = vector.load %arg9[%86, %c0_27] : memref<128x512xbf16, #tpu.memory_space<vmem>>, vector<16x512xbf16>
    %88 = arith.extf %87 : vector<16x512xbf16> to vector<16x512xf32>
    %89 = arith.truncf %83 : vector<16x128xf32> to vector<16x128xbf16>
    %c0_28 = arith.constant 0 : index
    %c0_29 = arith.constant 0 : index
    %90 = vector.load %arg3[%c0_28, %c0_29] : memref<128x512xbf16, #tpu.memory_space<vmem>>, vector<128x512xbf16>
    %cst_30 = arith.constant dense<0.000000e+00> : vector<16x512xf32>
    %91 = tpu.matmul %89, %90, %cst_30 {dimension_numbers = #tpu.dot_dimension_numbers<[1], [0], [0], [1], [0, 0, 1, 1], [], []>} : vector<16x128xbf16>, vector<128x512xbf16>, vector<16x512xf32> -> vector<16x512xf32>
    %92 = arith.addf %88, %91 : vector<16x512xf32>
    %93 = vector.extract_strided_slice %92 {offsets = [0, 0], sizes = [16, 128], strides = [1, 1]} : vector<16x512xf32> to vector<16x128xf32>
    %94 = arith.negf %93 : vector<16x128xf32>
    %95 = math.exp %94 : vector<16x128xf32>
    %cst_31 = arith.constant 1.000000e+00 : f32
    %96 = vector.broadcast %cst_31 : f32 to vector<16x128xf32>
    %97 = arith.addf %96, %95 : vector<16x128xf32>
    %98 = arith.divf %96, %97 : vector<16x128xf32>
    %99 = vector.extract_strided_slice %92 {offsets = [0, 128], sizes = [16, 128], strides = [1, 1]} : vector<16x512xf32> to vector<16x128xf32>
    %100 = arith.negf %99 : vector<16x128xf32>
    %101 = math.exp %100 : vector<16x128xf32>
    %cst_32 = arith.constant 1.000000e+00 : f32
    %102 = vector.broadcast %cst_32 : f32 to vector<16x128xf32>
    %103 = arith.addf %102, %101 : vector<16x128xf32>
    %104 = arith.divf %102, %103 : vector<16x128xf32>
    %105 = vector.extract_strided_slice %92 {offsets = [0, 256], sizes = [16, 128], strides = [1, 1]} : vector<16x512xf32> to vector<16x128xf32>
    %106 = math.tanh %105 : vector<16x128xf32>
    %107 = vector.extract_strided_slice %92 {offsets = [0, 384], sizes = [16, 128], strides = [1, 1]} : vector<16x512xf32> to vector<16x128xf32>
    %108 = arith.negf %107 : vector<16x128xf32>
    %109 = math.exp %108 : vector<16x128xf32>
    %cst_33 = arith.constant 1.000000e+00 : f32
    %110 = vector.broadcast %cst_33 : f32 to vector<16x128xf32>
    %111 = arith.addf %110, %109 : vector<16x128xf32>
    %112 = arith.divf %110, %111 : vector<16x128xf32>
    %113 = arith.mulf %104, %81 : vector<16x128xf32>
    %114 = arith.mulf %98, %106 : vector<16x128xf32>
    %115 = arith.addf %113, %114 : vector<16x128xf32>
    %116 = math.tanh %115 : vector<16x128xf32>
    %117 = arith.mulf %112, %116 : vector<16x128xf32>
    %c3_i32 = arith.constant 3 : i32
    %c16_i32_34 = arith.constant 16 : i32
    %118 = arith.muli %c3_i32, %c16_i32_34 : i32
    %119 = tpu.assume_multiple %118, 16 : i32
    %120 = arith.index_cast %119 : i32 to index
    %c0_35 = arith.constant 0 : index
    %121 = vector.load %arg9[%120, %c0_35] : memref<128x512xbf16, #tpu.memory_space<vmem>>, vector<16x512xbf16>
    %122 = arith.extf %121 : vector<16x512xbf16> to vector<16x512xf32>
    %123 = arith.truncf %117 : vector<16x128xf32> to vector<16x128xbf16>
    %c0_36 = arith.constant 0 : index
    %c0_37 = arith.constant 0 : index
    %124 = vector.load %arg3[%c0_36, %c0_37] : memref<128x512xbf16, #tpu.memory_space<vmem>>, vector<128x512xbf16>
    %cst_38 = arith.constant dense<0.000000e+00> : vector<16x512xf32>
    %125 = tpu.matmul %123, %124, %cst_38 {dimension_numbers = #tpu.dot_dimension_numbers<[1], [0], [0], [1], [0, 0, 1, 1], [], []>} : vector<16x128xbf16>, vector<128x512xbf16>, vector<16x512xf32> -> vector<16x512xf32>
    %126 = arith.addf %122, %125 : vector<16x512xf32>
    %127 = vector.extract_strided_slice %126 {offsets = [0, 0], sizes = [16, 128], strides = [1, 1]} : vector<16x512xf32> to vector<16x128xf32>
    %128 = arith.negf %127 : vector<16x128xf32>
    %129 = math.exp %128 : vector<16x128xf32>
    %cst_39 = arith.constant 1.000000e+00 : f32
    %130 = vector.broadcast %cst_39 : f32 to vector<16x128xf32>
    %131 = arith.addf %130, %129 : vector<16x128xf32>
    %132 = arith.divf %130, %131 : vector<16x128xf32>
    %133 = vector.extract_strided_slice %126 {offsets = [0, 128], sizes = [16, 128], strides = [1, 1]} : vector<16x512xf32> to vector<16x128xf32>
    %134 = arith.negf %133 : vector<16x128xf32>
    %135 = math.exp %134 : vector<16x128xf32>
    %cst_40 = arith.constant 1.000000e+00 : f32
    %136 = vector.broadcast %cst_40 : f32 to vector<16x128xf32>
    %137 = arith.addf %136, %135 : vector<16x128xf32>
    %138 = arith.divf %136, %137 : vector<16x128xf32>
    %139 = vector.extract_strided_slice %126 {offsets = [0, 256], sizes = [16, 128], strides = [1, 1]} : vector<16x512xf32> to vector<16x128xf32>
    %140 = math.tanh %139 : vector<16x128xf32>
    %141 = vector.extract_strided_slice %126 {offsets = [0, 384], sizes = [16, 128], strides = [1, 1]} : vector<16x512xf32> to vector<16x128xf32>
    %142 = arith.negf %141 : vector<16x128xf32>
    %143 = math.exp %142 : vector<16x128xf32>
    %cst_41 = arith.constant 1.000000e+00 : f32
    %144 = vector.broadcast %cst_41 : f32 to vector<16x128xf32>
    %145 = arith.addf %144, %143 : vector<16x128xf32>
    %146 = arith.divf %144, %145 : vector<16x128xf32>
    %147 = arith.mulf %138, %115 : vector<16x128xf32>
    %148 = arith.mulf %132, %140 : vector<16x128xf32>
    %149 = arith.addf %147, %148 : vector<16x128xf32>
    %150 = math.tanh %149 : vector<16x128xf32>
    %151 = arith.mulf %146, %150 : vector<16x128xf32>
    %c4_i32 = arith.constant 4 : i32
    %c16_i32_42 = arith.constant 16 : i32
    %152 = arith.muli %c4_i32, %c16_i32_42 : i32
    %153 = tpu.assume_multiple %152, 16 : i32
    %154 = arith.index_cast %153 : i32 to index
    %c0_43 = arith.constant 0 : index
    %155 = vector.load %arg9[%154, %c0_43] : memref<128x512xbf16, #tpu.memory_space<vmem>>, vector<16x512xbf16>
    %156 = arith.extf %155 : vector<16x512xbf16> to vector<16x512xf32>
    %157 = arith.truncf %151 : vector<16x128xf32> to vector<16x128xbf16>
    %c0_44 = arith.constant 0 : index
    %c0_45 = arith.constant 0 : index
    %158 = vector.load %arg3[%c0_44, %c0_45] : memref<128x512xbf16, #tpu.memory_space<vmem>>, vector<128x512xbf16>
    %cst_46 = arith.constant dense<0.000000e+00> : vector<16x512xf32>
    %159 = tpu.matmul %157, %158, %cst_46 {dimension_numbers = #tpu.dot_dimension_numbers<[1], [0], [0], [1], [0, 0, 1, 1], [], []>} : vector<16x128xbf16>, vector<128x512xbf16>, vector<16x512xf32> -> vector<16x512xf32>
    %160 = arith.addf %156, %159 : vector<16x512xf32>
    %161 = vector.extract_strided_slice %160 {offsets = [0, 0], sizes = [16, 128], strides = [1, 1]} : vector<16x512xf32> to vector<16x128xf32>
    %162 = arith.negf %161 : vector<16x128xf32>
    %163 = math.exp %162 : vector<16x128xf32>
    %cst_47 = arith.constant 1.000000e+00 : f32
    %164 = vector.broadcast %cst_47 : f32 to vector<16x128xf32>
    %165 = arith.addf %164, %163 : vector<16x128xf32>
    %166 = arith.divf %164, %165 : vector<16x128xf32>
    %167 = vector.extract_strided_slice %160 {offsets = [0, 128], sizes = [16, 128], strides = [1, 1]} : vector<16x512xf32> to vector<16x128xf32>
    %168 = arith.negf %167 : vector<16x128xf32>
    %169 = math.exp %168 : vector<16x128xf32>
    %cst_48 = arith.constant 1.000000e+00 : f32
    %170 = vector.broadcast %cst_48 : f32 to vector<16x128xf32>
    %171 = arith.addf %170, %169 : vector<16x128xf32>
    %172 = arith.divf %170, %171 : vector<16x128xf32>
    %173 = vector.extract_strided_slice %160 {offsets = [0, 256], sizes = [16, 128], strides = [1, 1]} : vector<16x512xf32> to vector<16x128xf32>
    %174 = math.tanh %173 : vector<16x128xf32>
    %175 = vector.extract_strided_slice %160 {offsets = [0, 384], sizes = [16, 128], strides = [1, 1]} : vector<16x512xf32> to vector<16x128xf32>
    %176 = arith.negf %175 : vector<16x128xf32>
    %177 = math.exp %176 : vector<16x128xf32>
    %cst_49 = arith.constant 1.000000e+00 : f32
    %178 = vector.broadcast %cst_49 : f32 to vector<16x128xf32>
    %179 = arith.addf %178, %177 : vector<16x128xf32>
    %180 = arith.divf %178, %179 : vector<16x128xf32>
    %181 = arith.mulf %172, %149 : vector<16x128xf32>
    %182 = arith.mulf %166, %174 : vector<16x128xf32>
    %183 = arith.addf %181, %182 : vector<16x128xf32>
    %184 = math.tanh %183 : vector<16x128xf32>
    %185 = arith.mulf %180, %184 : vector<16x128xf32>
    %c5_i32 = arith.constant 5 : i32
    %c16_i32_50 = arith.constant 16 : i32
    %186 = arith.muli %c5_i32, %c16_i32_50 : i32
    %187 = tpu.assume_multiple %186, 16 : i32
    %188 = arith.index_cast %187 : i32 to index
    %c0_51 = arith.constant 0 : index
    %189 = vector.load %arg9[%188, %c0_51] : memref<128x512xbf16, #tpu.memory_space<vmem>>, vector<16x512xbf16>
    %190 = arith.extf %189 : vector<16x512xbf16> to vector<16x512xf32>
    %191 = arith.truncf %185 : vector<16x128xf32> to vector<16x128xbf16>
    %c0_52 = arith.constant 0 : index
    %c0_53 = arith.constant 0 : index
    %192 = vector.load %arg3[%c0_52, %c0_53] : memref<128x512xbf16, #tpu.memory_space<vmem>>, vector<128x512xbf16>
    %cst_54 = arith.constant dense<0.000000e+00> : vector<16x512xf32>
    %193 = tpu.matmul %191, %192, %cst_54 {dimension_numbers = #tpu.dot_dimension_numbers<[1], [0], [0], [1], [0, 0, 1, 1], [], []>} : vector<16x128xbf16>, vector<128x512xbf16>, vector<16x512xf32> -> vector<16x512xf32>
    %194 = arith.addf %190, %193 : vector<16x512xf32>
    %195 = vector.extract_strided_slice %194 {offsets = [0, 0], sizes = [16, 128], strides = [1, 1]} : vector<16x512xf32> to vector<16x128xf32>
    %196 = arith.negf %195 : vector<16x128xf32>
    %197 = math.exp %196 : vector<16x128xf32>
    %cst_55 = arith.constant 1.000000e+00 : f32
    %198 = vector.broadcast %cst_55 : f32 to vector<16x128xf32>
    %199 = arith.addf %198, %197 : vector<16x128xf32>
    %200 = arith.divf %198, %199 : vector<16x128xf32>
    %201 = vector.extract_strided_slice %194 {offsets = [0, 128], sizes = [16, 128], strides = [1, 1]} : vector<16x512xf32> to vector<16x128xf32>
    %202 = arith.negf %201 : vector<16x128xf32>
    %203 = math.exp %202 : vector<16x128xf32>
    %cst_56 = arith.constant 1.000000e+00 : f32
    %204 = vector.broadcast %cst_56 : f32 to vector<16x128xf32>
    %205 = arith.addf %204, %203 : vector<16x128xf32>
    %206 = arith.divf %204, %205 : vector<16x128xf32>
    %207 = vector.extract_strided_slice %194 {offsets = [0, 256], sizes = [16, 128], strides = [1, 1]} : vector<16x512xf32> to vector<16x128xf32>
    %208 = math.tanh %207 : vector<16x128xf32>
    %209 = vector.extract_strided_slice %194 {offsets = [0, 384], sizes = [16, 128], strides = [1, 1]} : vector<16x512xf32> to vector<16x128xf32>
    %210 = arith.negf %209 : vector<16x128xf32>
    %211 = math.exp %210 : vector<16x128xf32>
    %cst_57 = arith.constant 1.000000e+00 : f32
    %212 = vector.broadcast %cst_57 : f32 to vector<16x128xf32>
    %213 = arith.addf %212, %211 : vector<16x128xf32>
    %214 = arith.divf %212, %213 : vector<16x128xf32>
    %215 = arith.mulf %206, %183 : vector<16x128xf32>
    %216 = arith.mulf %200, %208 : vector<16x128xf32>
    %217 = arith.addf %215, %216 : vector<16x128xf32>
    %218 = math.tanh %217 : vector<16x128xf32>
    %219 = arith.mulf %214, %218 : vector<16x128xf32>
    %c6_i32 = arith.constant 6 : i32
    %c16_i32_58 = arith.constant 16 : i32
    %220 = arith.muli %c6_i32, %c16_i32_58 : i32
    %221 = tpu.assume_multiple %220, 16 : i32
    %222 = arith.index_cast %221 : i32 to index
    %c0_59 = arith.constant 0 : index
    %223 = vector.load %arg9[%222, %c0_59] : memref<128x512xbf16, #tpu.memory_space<vmem>>, vector<16x512xbf16>
    %224 = arith.extf %223 : vector<16x512xbf16> to vector<16x512xf32>
    %225 = arith.truncf %219 : vector<16x128xf32> to vector<16x128xbf16>
    %c0_60 = arith.constant 0 : index
    %c0_61 = arith.constant 0 : index
    %226 = vector.load %arg3[%c0_60, %c0_61] : memref<128x512xbf16, #tpu.memory_space<vmem>>, vector<128x512xbf16>
    %cst_62 = arith.constant dense<0.000000e+00> : vector<16x512xf32>
    %227 = tpu.matmul %225, %226, %cst_62 {dimension_numbers = #tpu.dot_dimension_numbers<[1], [0], [0], [1], [0, 0, 1, 1], [], []>} : vector<16x128xbf16>, vector<128x512xbf16>, vector<16x512xf32> -> vector<16x512xf32>
    %228 = arith.addf %224, %227 : vector<16x512xf32>
    %229 = vector.extract_strided_slice %228 {offsets = [0, 0], sizes = [16, 128], strides = [1, 1]} : vector<16x512xf32> to vector<16x128xf32>
    %230 = arith.negf %229 : vector<16x128xf32>
    %231 = math.exp %230 : vector<16x128xf32>
    %cst_63 = arith.constant 1.000000e+00 : f32
    %232 = vector.broadcast %cst_63 : f32 to vector<16x128xf32>
    %233 = arith.addf %232, %231 : vector<16x128xf32>
    %234 = arith.divf %232, %233 : vector<16x128xf32>
    %235 = vector.extract_strided_slice %228 {offsets = [0, 128], sizes = [16, 128], strides = [1, 1]} : vector<16x512xf32> to vector<16x128xf32>
    %236 = arith.negf %235 : vector<16x128xf32>
    %237 = math.exp %236 : vector<16x128xf32>
    %cst_64 = arith.constant 1.000000e+00 : f32
    %238 = vector.broadcast %cst_64 : f32 to vector<16x128xf32>
    %239 = arith.addf %238, %237 : vector<16x128xf32>
    %240 = arith.divf %238, %239 : vector<16x128xf32>
    %241 = vector.extract_strided_slice %228 {offsets = [0, 256], sizes = [16, 128], strides = [1, 1]} : vector<16x512xf32> to vector<16x128xf32>
    %242 = math.tanh %241 : vector<16x128xf32>
    %243 = vector.extract_strided_slice %228 {offsets = [0, 384], sizes = [16, 128], strides = [1, 1]} : vector<16x512xf32> to vector<16x128xf32>
    %244 = arith.negf %243 : vector<16x128xf32>
    %245 = math.exp %244 : vector<16x128xf32>
    %cst_65 = arith.constant 1.000000e+00 : f32
    %246 = vector.broadcast %cst_65 : f32 to vector<16x128xf32>
    %247 = arith.addf %246, %245 : vector<16x128xf32>
    %248 = arith.divf %246, %247 : vector<16x128xf32>
    %249 = arith.mulf %240, %217 : vector<16x128xf32>
    %250 = arith.mulf %234, %242 : vector<16x128xf32>
    %251 = arith.addf %249, %250 : vector<16x128xf32>
    %252 = math.tanh %251 : vector<16x128xf32>
    %253 = arith.mulf %248, %252 : vector<16x128xf32>
    %c7_i32 = arith.constant 7 : i32
    %c16_i32_66 = arith.constant 16 : i32
    %254 = arith.muli %c7_i32, %c16_i32_66 : i32
    %255 = tpu.assume_multiple %254, 16 : i32
    %256 = arith.index_cast %255 : i32 to index
    %c0_67 = arith.constant 0 : index
    %257 = vector.load %arg9[%256, %c0_67] : memref<128x512xbf16, #tpu.memory_space<vmem>>, vector<16x512xbf16>
    %258 = arith.extf %257 : vector<16x512xbf16> to vector<16x512xf32>
    %259 = arith.truncf %253 : vector<16x128xf32> to vector<16x128xbf16>
    %c0_68 = arith.constant 0 : index
    %c0_69 = arith.constant 0 : index
    %260 = vector.load %arg3[%c0_68, %c0_69] : memref<128x512xbf16, #tpu.memory_space<vmem>>, vector<128x512xbf16>
    %cst_70 = arith.constant dense<0.000000e+00> : vector<16x512xf32>
    %261 = tpu.matmul %259, %260, %cst_70 {dimension_numbers = #tpu.dot_dimension_numbers<[1], [0], [0], [1], [0, 0, 1, 1], [], []>} : vector<16x128xbf16>, vector<128x512xbf16>, vector<16x512xf32> -> vector<16x512xf32>
    %262 = arith.addf %258, %261 : vector<16x512xf32>
    %263 = vector.extract_strided_slice %262 {offsets = [0, 0], sizes = [16, 128], strides = [1, 1]} : vector<16x512xf32> to vector<16x128xf32>
    %264 = arith.negf %263 : vector<16x128xf32>
    %265 = math.exp %264 : vector<16x128xf32>
    %cst_71 = arith.constant 1.000000e+00 : f32
    %266 = vector.broadcast %cst_71 : f32 to vector<16x128xf32>
    %267 = arith.addf %266, %265 : vector<16x128xf32>
    %268 = arith.divf %266, %267 : vector<16x128xf32>
    %269 = vector.extract_strided_slice %262 {offsets = [0, 128], sizes = [16, 128], strides = [1, 1]} : vector<16x512xf32> to vector<16x128xf32>
    %270 = arith.negf %269 : vector<16x128xf32>
    %271 = math.exp %270 : vector<16x128xf32>
    %cst_72 = arith.constant 1.000000e+00 : f32
    %272 = vector.broadcast %cst_72 : f32 to vector<16x128xf32>
    %273 = arith.addf %272, %271 : vector<16x128xf32>
    %274 = arith.divf %272, %273 : vector<16x128xf32>
    %275 = vector.extract_strided_slice %262 {offsets = [0, 256], sizes = [16, 128], strides = [1, 1]} : vector<16x512xf32> to vector<16x128xf32>
    %276 = math.tanh %275 : vector<16x128xf32>
    %277 = vector.extract_strided_slice %262 {offsets = [0, 384], sizes = [16, 128], strides = [1, 1]} : vector<16x512xf32> to vector<16x128xf32>
    %278 = arith.negf %277 : vector<16x128xf32>
    %279 = math.exp %278 : vector<16x128xf32>
    %cst_73 = arith.constant 1.000000e+00 : f32
    %280 = vector.broadcast %cst_73 : f32 to vector<16x128xf32>
    %281 = arith.addf %280, %279 : vector<16x128xf32>
    %282 = arith.divf %280, %281 : vector<16x128xf32>
    %283 = arith.mulf %274, %251 : vector<16x128xf32>
    %284 = arith.mulf %268, %276 : vector<16x128xf32>
    %285 = arith.addf %283, %284 : vector<16x128xf32>
    %286 = math.tanh %285 : vector<16x128xf32>
    %287 = arith.mulf %282, %286 : vector<16x128xf32>
    %c8_i32 = arith.constant 8 : i32
    %c0_74 = arith.constant 0 : index
    %c0_75 = arith.constant 0 : index
    %288 = vector.load %arg10[%c0_74, %c0_75] : memref<16x128xf32, #tpu.memory_space<vmem>>, vector<16x128xf32>
    tpu.vector_store %arg10[%c0_74, %c0_75], %287 {strides = array<i32>} : memref<16x128xf32, #tpu.memory_space<vmem>>, vector<16x128xf32>,
    %c0_76 = arith.constant 0 : index
    %c0_77 = arith.constant 0 : index
    %289 = vector.load %arg11[%c0_76, %c0_77] : memref<16x128xf32, #tpu.memory_space<vmem>>, vector<16x128xf32>
    tpu.vector_store %arg11[%c0_76, %c0_77], %285 {strides = array<i32>} : memref<16x128xf32, #tpu.memory_space<vmem>>, vector<16x128xf32>,
    %c0_i32_78 = arith.constant 0 : i32
    %290 = arith.cmpi eq, %arg0, %c0_i32_78 : i32
    %291 = arith.extui %290 : i1 to i32
    %c0_i32_79 = arith.constant 0 : i32
    %292 = arith.cmpi ne, %291, %c0_i32_79 : i32
    scf.if %292 {
      %293 = arith.truncf %287 : vector<16x128xf32> to vector<16x128xbf16>
      %c0_80 = arith.constant 0 : index
      %c0_81 = arith.constant 0 : index
      %294 = vector.load %arg4[%c0_80, %c0_81] : memref<128x256xbf16, #tpu.memory_space<vmem>>, vector<128x256xbf16>
      %cst_82 = arith.constant dense<0.000000e+00> : vector<16x256xf32>
      %295 = tpu.matmul %293, %294, %cst_82 {dimension_numbers = #tpu.dot_dimension_numbers<[1], [0], [0], [1], [0, 0, 1, 1], [], []>} : vector<16x128xbf16>, vector<128x256xbf16>, vector<16x256xf32> -> vector<16x256xf32>
      %c0_83 = arith.constant 0 : index
      %c0_84 = arith.constant 0 : index
      %296 = vector.load %arg5[%c0_83, %c0_84] : memref<1x256xf32, #tpu.memory_space<vmem>>, vector<1x256xf32>
      %297 = vector.broadcast %296 : vector<1x256xf32> to vector<16x256xf32>
      %298 = arith.addf %295, %297 : vector<16x256xf32>
      %cst_85 = arith.constant 0.000000e+00 : f32
      %299 = vector.broadcast %cst_85 : f32 to vector<16x256xf32>
      %300 = arith.maximumf %298, %299 : vector<16x256xf32>
      %301 = arith.truncf %300 : vector<16x256xf32> to vector<16x256xbf16>
      %c0_86 = arith.constant 0 : index
      %c0_87 = arith.constant 0 : index
      %302 = vector.load %arg6[%c0_86, %c0_87] : memref<256x128xbf16, #tpu.memory_space<vmem>>, vector<256x128xbf16>
      %cst_88 = arith.constant dense<0.000000e+00> : vector<16x128xf32>
      %303 = tpu.matmul %301, %302, %cst_88 {dimension_numbers = #tpu.dot_dimension_numbers<[1], [0], [0], [1], [0, 0, 1, 1], [], []>} : vector<16x256xbf16>, vector<256x128xbf16>, vector<16x128xf32> -> vector<16x128xf32>
      %c0_89 = arith.constant 0 : index
      %c0_90 = arith.constant 0 : index
      %304 = vector.load %arg7[%c0_89, %c0_90] : memref<1x128xf32, #tpu.memory_space<vmem>>, vector<1x128xf32>
      %305 = vector.broadcast %304 : vector<1x128xf32> to vector<16x128xf32>
      %306 = arith.addf %303, %305 : vector<16x128xf32>
      %307 = arith.negf %306 : vector<16x128xf32>
      %308 = math.exp %307 : vector<16x128xf32>
      %cst_91 = arith.constant 1.000000e+00 : f32
      %309 = vector.broadcast %cst_91 : f32 to vector<16x128xf32>
      %310 = arith.addf %309, %308 : vector<16x128xf32>
      %311 = arith.divf %309, %310 : vector<16x128xf32>
      %c0_92 = arith.constant 0 : index
      %c0_93 = arith.constant 0 : index
      %312 = vector.load %arg8[%c0_92, %c0_93] : memref<16x128xf32, #tpu.memory_space<vmem>>, vector<16x128xf32>
      tpu.vector_store %arg8[%c0_92, %c0_93], %311 {strides = array<i32>} : memref<16x128xf32, #tpu.memory_space<vmem>>, vector<16x128xf32>,
    } else {
    }
    return
  }
  func.func @transform_0(%arg0: i32) -> (i32, i32) {
    %c0_i32 = arith.constant 0 : i32
    %c0_i32_0 = arith.constant 0 : i32
    return %arg0, %c0_i32 : i32, i32
  }
  func.func @transform_1(%arg0: i32) -> (i32, i32) {
    %c0_i32 = arith.constant 0 : i32
    %c0_i32_0 = arith.constant 0 : i32
    %c0_i32_1 = arith.constant 0 : i32
    return %c0_i32, %c0_i32_0 : i32, i32
  }
  func.func @transform_2(%arg0: i32) -> (i32, i32) {
    %c0_i32 = arith.constant 0 : i32
    %c0_i32_0 = arith.constant 0 : i32
    %c0_i32_1 = arith.constant 0 : i32
    return %c0_i32, %c0_i32_0 : i32, i32
  }
  func.func @transform_3(%arg0: i32) -> (i32, i32) {
    %c0_i32 = arith.constant 0 : i32
    %c0_i32_0 = arith.constant 0 : i32
    %c0_i32_1 = arith.constant 0 : i32
    return %c0_i32, %c0_i32_0 : i32, i32
  }
  func.func @transform_4(%arg0: i32) -> (i32, i32) {
    %c0_i32 = arith.constant 0 : i32
    %c0_i32_0 = arith.constant 0 : i32
    %c0_i32_1 = arith.constant 0 : i32
    return %c0_i32, %c0_i32_0 : i32, i32
  }
  func.func @transform_5(%arg0: i32) -> (i32, i32) {
    %c0_i32 = arith.constant 0 : i32
    %c0_i32_0 = arith.constant 0 : i32
    %c0_i32_1 = arith.constant 0 : i32
    return %c0_i32, %c0_i32_0 : i32, i32
  }
  func.func @transform_6(%arg0: i32) -> (i32, i32) {
    %c0_i32 = arith.constant 0 : i32
    %c0_i32_0 = arith.constant 0 : i32
    %c0_i32_1 = arith.constant 0 : i32
    return %c0_i32, %c0_i32_0 : i32, i32
  }
  func.func @transform_7(%arg0: i32) -> (i32, i32) {
    %c0_i32 = arith.constant 0 : i32
    %c0_i32_0 = arith.constant 0 : i32
    %c0_i32_1 = arith.constant 0 : i32
    return %c0_i32, %c0_i32_0 : i32, i32
  }
}

</mosaic_0001>

<bundles_post_ra>
// kernel: tpu_custom_call.1
= control target key start
LH: loop header
LB: loop body
LE: loop exit
PB: predicated region body
PF: predicated region fallthrough
CT: control target
= control target key end

     0   :  { %12 = vsyncpa [#allocation6], 0  ;;  %s4016_s0 = inlined_call_operand.vmem [shape: s32[128,1], index: 0, kind: input, shape index: {}]   ;;  %s4017_s1 = inlined_call_operand.vmem [shape: bf16[64,512], index: 1, kind: input, shape index: {}]   ;;  %s4018_s2 = inlined_call_operand.hbm [shape: bf16[128,512], index: 2, kind: input, shape index: {}]   ;;  %s4019_s3 = inlined_call_operand.hbm [shape: bf16[128,256], index: 3, kind: input, shape index: {}]   ;;  %s4020_s4 = inlined_call_operand.vmem [shape: f32[1,256], index: 4, kind: input, shape index: {}]   ;;  %s4021_s5 = inlined_call_operand.hbm [shape: bf16[256,128], index: 5, kind: input, shape index: {}]   ;;  %s4022_s6 = inlined_call_operand.vmem [shape: f32[1,128], index: 6, kind: input, shape index: {}]   ;;  %s4023_s7 = inlined_call_operand.hbm [shape: f32[16,128], index: 7, kind: output, shape index: {}]  }
   0x1   :  { %13 = vsyncpa [#allocation9], 0 }
   0x2   :  { %14 = vsyncpa [#allocation7], 0  ;;  %s3152_s24 = smov [#allocation8]   ;;  %s3058_s28 = scalar_lea.hbm %s4019_s3, 2048 }
   0x3   :  { %s36_s25 = sshll.u32 %s3152_s24, 4  ;;  %p3059_p0 = scmp.ne.s32.totalorder %s4019_s3, %s3058_s28  ;;  %s37_s25 = int_to_ptr.vmem [resolvable:$true] %s36_s25 }
   0x4   :  { %p3062_p1 = scmp.lt.u32.totalorder %s3058_s28, %s4019_s3 }
   0x6   :  { %p3064_p2 = pnand %p3062_p1, %p3059_p0 }
   0x8   :  { %3067 = shalt.err (!%p3064_p2)
}
   0x9   :  { %s3068_s10 = scalar_lea.vmem %s37_s25, 2048  ;;  %p3073_p4 = scmp.lt.s32.totalorder %s37_s25, %s37_s25 }
   0xa   :  { %p3069_p3 = scmp.ne.s32.totalorder %s37_s25, %s3068_s10  ;;  %p3074_p5 = scmp.lt.s32.totalorder %s3068_s10, %s3068_s10 }
   0xc   :  { %p3075_p6 = por %p3074_p5, %p3073_p4 }
   0xe   :  { %p3076_p7 = pnand %p3075_p6, %p3069_p3 }
  0x10   :  { %3079 = shalt.err (!%p3076_p7)
}
  0x11   :  { %s3153_s11 = smov 128   ;;  %s3154_s12 = smov 8  }
  0x12   :  { %42 = dma.hbm_to_vmem [thread:$0]  %s4019_s3, 2048, %s37_s25, [#allocation9], %s3153_s11, %s3153_s11, %s3154_s12  }
  0x13   :  { %s3155_s15 = smov [#allocation5]   ;;  %s3080_s19 = scalar_lea.hbm %s4018_s2, 4096 }
  0x14   :  { %s24_s16 = sshll.u32 %s3155_s15, 4  ;;  %p3081_p8 = scmp.ne.s32.totalorder %s4018_s2, %s3080_s19  ;;  %s25_s16 = int_to_ptr.vmem [resolvable:$true] %s24_s16 }
  0x15   :  { %p3084_p9 = scmp.lt.u32.totalorder %s3080_s19, %s4018_s2 }
  0x17   :  { %p3086_p10 = pnand %p3084_p9, %p3081_p8 }
  0x19   :  { %3089 = shalt.err (!%p3086_p10)
}
  0x1a   :  { %s3090_s24 = scalar_lea.vmem %s25_s16, 4096  ;;  %p3095_p12 = scmp.lt.s32.totalorder %s25_s16, %s25_s16 }
  0x1b   :  { %p3091_p11 = scmp.ne.s32.totalorder %s25_s16, %s3090_s24  ;;  %p3096_p13 = scmp.lt.s32.totalorder %s3090_s24, %s3090_s24 }
  0x1d   :  { %p3097_p0 = por %p3096_p13, %p3095_p12 }
  0x1f   :  { %p3098_p1 = pnand %p3097_p0, %p3091_p11 }
  0x21   :  { %3101 = shalt.err (!%p3098_p1)
}
  0x22   :  { %s3156_s3 = smov 256   ;;  %s3157_s25 = smov 16  }
  0x23   :  { %30 = dma.hbm_to_vmem [thread:$0]  %s4018_s2, 4096, %s25_s16, [#allocation6], %s3156_s3, %s3156_s3, %s3157_s25  }
  0x24   :  { %s3158_s28 = smov [#allocation10]   ;;  %s3102_s9 = scalar_lea.hbm %s4021_s5, 2048 }
  0x25   :  { %s50_s29 = sshll.u32 %s3158_s28, 4  ;;  %p3103_p2 = scmp.ne.s32.totalorder %s4021_s5, %s3102_s9  ;;  %s51_s29 = int_to_ptr.vmem [resolvable:$true] %s50_s29 }
  0x26   :  { %p3106_p3 = scmp.lt.u32.totalorder %s3102_s9, %s4021_s5 }
  0x28   :  { %p3108_p4 = pnand %p3106_p3, %p3103_p2 }
  0x2a   :  { %3111 = shalt.err (!%p3108_p4)
}
  0x2b   :  { %s3112_s17 = scalar_lea.vmem %s51_s29, 2048  ;;  %p3117_p6 = scmp.lt.s32.totalorder %s51_s29, %s51_s29 }
  0x2c   :  { %p3113_p5 = scmp.ne.s32.totalorder %s51_s29, %s3112_s17  ;;  %p3118_p7 = scmp.lt.s32.totalorder %s3112_s17, %s3112_s17 }
  0x2e   :  { %p3119_p8 = por %p3118_p7, %p3117_p6 }
  0x30   :  { %p3120_p9 = pnand %p3119_p8, %p3113_p5 }
  0x32   :  { %3123 = shalt.err (!%p3120_p9)
}
  0x33   :  { %s3159_s2 = smov 64   ;;  %s3160_s16 = smov 4  }
  0x34   :  { %56 = dma.hbm_to_vmem [thread:$0]  %s4021_s5, 2048, %s51_s29, [#allocation9], %s3159_s2, %s3159_s2, %s3160_s16  }
  0x35   :  { %3146 = dma.done.wait [#allocation6], 4096  }
  0x36   :  { %3147 = vsyncadd [#allocation6], 4294963200 }
  0x37   :  { %3148 = dma.done.wait [#allocation9], 4096  }
  0x38   :  { %3149 = vsyncadd [#allocation9], 4294963200  ;;  %v4025_v0 = vmov 0   ;;  %v79_v1 = vld [vmem:[%s4016_s0 + $0x10] sm:$0xff]  ;;  %v77_v2 = vld [vmem:[%s4016_s0] sm:$0xff]  ;;  %v4024_v35 = vlaneseq  ;;  %v3162_v40 = vmov 0.0  }
  0x39   :  { %2649 = vset.pattern.permute.xlu1 %v4025_v0  ;;  %2648 = vset.pattern.permute.xlu0 %v4025_v0  ;;  %v80_v3 = vld [vmem:[%s4016_s0 + $0x18] sm:$0xff]  ;;  %v78_v4 = vld [vmem:[%s4016_s0 + $0x8] sm:$0xff]  ;;  %v81_v6 = vld [vmem:[%s4016_s0 + $0x20] sm:$0xff]  ;;  %vm295_vm2 = vcmask 523264   ;;  %s3164_s14 = smov [#allocation11]  }
  0x3a   :  { %352 = vmatprep.mubr.bf16.mxu0 %v4025_v0  ;;  %465 = vmatprep.mubr.bf16.mxu1 %v4025_v0  ;;  %v82_v5 = vld [vmem:[%s4016_s0 + $0x28] sm:$0xff]  ;;  %v2650_v7 = vld [vmem:[%s4017_s1 + $0x4] ss:$16 sps:$4 sm:$0xff]   ;;  %v2652_v8 = vld [vmem:[%s4017_s1] ss:$16 sps:$4 sm:$0xff]   ;;  %v3351_v36 = vand.u32 127, %v4024_v35 }
  0x3b   :  { %102 = vperm.xlu1 %2649, %v79_v1   ;;  %96 = vperm.xlu0 %2648, %v77_v2   ;;  %v2653_v9 = vld [vmem:[%s4017_s1 + $0xc] ss:$16 sps:$4 sm:$0xff]   ;;  %v2655_v10 = vld [vmem:[%s4017_s1 + $0x8] ss:$16 sps:$4 sm:$0xff]   ;;  %v2656_v12 = vld [vmem:[%s4017_s1 + $0x24] ss:$16 sps:$4 sm:$0xff]  }
  0x3c   :  { %v84_v11 = vld [vmem:[%s4016_s0 + $0x38] sm:$0xff]  ;;  %320 = vmatprep.subr.bf16.mxu0 %v2650_v7  ;;  %v83_v13 = vld [vmem:[%s4016_s0 + $0x30] sm:$0xff]  ;;  %433 = vmatprep.subr.bf16.mxu1 %v2653_v9  ;;  %v86_v19 = vld [vmem:[%s4016_s0 + $0x48] sm:$0xff]  ;;  %s2430_s15 = sshll.u32 %s3164_s14, 4  ;;  %s2431_s15 = int_to_ptr.vmem [resolvable:$true] %s2430_s15 }
  0x3d   :  { %321 = vmatpush1.bf16.msra.mxu0 %v2652_v8  ;;  %v2658_v14 = vld [vmem:[%s4017_s1 + $0x20] ss:$16 sps:$4 sm:$0xff]   ;;  %v2659_v15 = vld [vmem:[%s4017_s1 + $0x2c] ss:$16 sps:$4 sm:$0xff]   ;;  %434 = vmatpush1.bf16.msra.mxu1 %v2655_v10  ;;  %v2661_v16 = vld [vmem:[%s4017_s1 + $0x28] ss:$16 sps:$4 sm:$0xff]   ;;  %p3129_p11 = scmp.lt.s32.totalorder %s2431_s15, %s2431_s15 }
  0x3e   :  { %322 = vmatprep.subr.bf16.mxu0 %v2656_v12  ;;  %v2662_v17 = vld [vmem:[%s4017_s1 + $0x44] ss:$16 sps:$4 sm:$0xff]   ;;  %435 = vmatprep.subr.bf16.mxu1 %v2659_v15  ;;  %v2665_v18 = vld [vmem:[%s4017_s1 + $0x4c] ss:$16 sps:$4 sm:$0xff]   ;;  %v2664_v21 = vld [vmem:[%s4017_s1 + $0x40] ss:$16 sps:$4 sm:$0xff]  }
  0x3f   :  { %105 = vperm.xlu1 %2649, %v80_v3   ;;  %99 = vperm.xlu0 %2648, %v78_v4   ;;  %v85_v20 = vld [vmem:[%s4016_s0 + $0x40] sm:$0xff]  ;;  %v2667_v22 = vld [vmem:[%s4017_s1 + $0x48] ss:$16 sps:$4 sm:$0xff]   ;;  %v87_v25 = vld [vmem:[%s4016_s0 + $0x50] sm:$0xff] }
  0x40   :  { %v2668_v23 = vld [vmem:[%s4017_s1 + $0x64] ss:$16 sps:$4 sm:$0xff]   ;;  %v88_v24 = vld [vmem:[%s4016_s0 + $0x58] sm:$0xff]  ;;  %v2670_v27 = vld [vmem:[%s4017_s1 + $0x60] ss:$16 sps:$4 sm:$0xff]  }
  0x41   :  { %323 = vmatpush1.bf16.msra.mxu0 %v2658_v14  ;;  %436 = vmatpush1.bf16.msra.mxu1 %v2661_v16  ;;  %v2671_v26 = vld [vmem:[%s4017_s1 + $0x6c] ss:$16 sps:$4 sm:$0xff]   ;;  %v2673_v28 = vld [vmem:[%s4017_s1 + $0x68] ss:$16 sps:$4 sm:$0xff]   ;;  %v3332_v29 = vld [vmem:[#allocation5 + $0x4] ss:$16 sps:$4 sm:$0xff]  }
  0x42   :  { %324 = vmatprep.subr.bf16.mxu0 %v2662_v17  ;;  %437 = vmatprep.subr.bf16.mxu1 %v2665_v18  ;;  %v90_v30 = vld [vmem:[%s4016_s0 + $0x68] sm:$0xff]  ;;  %v89_v31 = vld [vmem:[%s4016_s0 + $0x60] sm:$0xff]  ;;  %v92_v33 = vld [vmem:[%s4016_s0 + $0x78] sm:$0xff] }
  0x43   :  { %111 = vperm.xlu1 %2649, %v82_v5   ;;  %108 = vperm.xlu0 %2648, %v81_v6   ;;  %v3341_v32 = vld [vmem:[#allocation5 + $0xc] ss:$16 sps:$4 sm:$0xff]   ;;  %v91_v34 = vld [vmem:[%s4016_s0 + $0x70] sm:$0xff]  ;;  %v3361_v47 = vld [vmem:[#allocation5 + $0x8] ss:$16 sps:$4 sm:$0xff]  }
  0x44   :  { %v3357_v43 = vld [vmem:[#allocation5] ss:$16 sps:$4 sm:$0xff]   ;;  %v3359_v45 = vld [vmem:[#allocation5 + $0x24] ss:$16 sps:$4 sm:$0xff]   ;;  %v3367_v48 = vld [vmem:[#allocation5 + $0x2c] ss:$16 sps:$4 sm:$0xff]  }
  0x45   :  { %325 = vmatpush1.bf16.msra.mxu0 %v2664_v21  ;;  %438 = vmatpush1.bf16.msra.mxu1 %v2667_v22  ;;  %v3371_v49 = vld [vmem:[#allocation5 + $0x20] ss:$16 sps:$4 sm:$0xff]   ;;  %v3375_v50 = vld [vmem:[#allocation5 + $0x44] ss:$16 sps:$4 sm:$0xff]   ;;  %v3380_v53 = vld [vmem:[#allocation5 + $0x28] ss:$16 sps:$4 sm:$0xff]  }
  0x46   :  { %326 = vmatprep.subr.bf16.mxu0 %v2668_v23  ;;  %439 = vmatprep.subr.bf16.mxu1 %v2671_v26  ;;  %v3385_v57 = vld [vmem:[#allocation5 + $0x40] ss:$16 sps:$4 sm:$0xff]   ;;  %v3387_v58 = vld [vmem:[#allocation5 + $0x4c] ss:$16 sps:$4 sm:$0xff]   ;;  %v3389_v59 = vld [vmem:[#allocation5 + $0x64] ss:$16 sps:$4 sm:$0xff]  }
  0x47   :  { %117 = vperm.xlu1 %2649, %v84_v11   ;;  %114 = vperm.xlu0 %2648, %v83_v13   ;;  %v3392_v60 = vld [vmem:[#allocation5 + $0x48] ss:$16 sps:$4 sm:$0xff]   ;;  %v3398_v61 = vld [vmem:[#allocation5 + $0x6c] ss:$16 sps:$4 sm:$0xff]   ;;  %v3403_v62 = vld [vmem:[#allocation5 + $0x60] ss:$16 sps:$4 sm:$0xff]  }
  0x48   :  { %v3409_v2 = vld [vmem:[#allocation5 + $0x84] ss:$16 sps:$4 sm:$0xff]   ;;  %v3412_v3 = vld [vmem:[#allocation5 + $0x68] ss:$16 sps:$4 sm:$0xff]   ;;  %v3416_v7 = vld [vmem:[#allocation5 + $0x80] ss:$16 sps:$4 sm:$0xff]  }
  0x49   :  { %327 = vmatpush1.bf16.msra.mxu0 %v2670_v27  ;;  %440 = vmatpush1.bf16.msra.mxu1 %v2673_v28  ;;  %v3418_v8 = vld [vmem:[#allocation5 + $0x8c] ss:$16 sps:$4 sm:$0xff]   ;;  %v3421_v9 = vld [vmem:[#allocation5 + $0xa4] ss:$16 sps:$4 sm:$0xff]   ;;  %v3424_v10 = vld [vmem:[#allocation5 + $0x88] ss:$16 sps:$4 sm:$0xff]  }
  0x4a   :  { %822 = vmatprep.subr.bf16.mxu0 %v3332_v29  ;;  %865 = vmatprep.subr.bf16.mxu1 %v3341_v32  ;;  %v3430_v11 = vld [vmem:[#allocation5 + $0xac] ss:$16 sps:$4 sm:$0xff]   ;;  %v3435_v12 = vld [vmem:[#allocation5 + $0xa0] ss:$16 sps:$4 sm:$0xff]   ;;  %v3441_v15 = vld [vmem:[#allocation5 + $0xc4] ss:$16 sps:$4 sm:$0xff]  }
  0x4b   :  { %123 = vperm.xlu1 %2649, %v86_v19   ;;  %120 = vperm.xlu0 %2648, %v85_v20   ;;  %v3444_v16 = vld [vmem:[#allocation5 + $0xa8] ss:$16 sps:$4 sm:$0xff]   ;;  %v3448_v20 = vld [vmem:[#allocation5 + $0xc0] ss:$16 sps:$4 sm:$0xff]   ;;  %v3450_v21 = vld [vmem:[#allocation5 + $0xcc] ss:$16 sps:$4 sm:$0xff]  }
  0x4c   :  { %v3454_v22 = vld [vmem:[#allocation5 + $0xe4] ss:$16 sps:$4 sm:$0xff]   ;;  %v3456_v23 = vld [vmem:[#allocation5 + $0xc8] ss:$16 sps:$4 sm:$0xff]  }
  0x4d   :  { %v3474_v28 = vld [vmem:[#allocation5 + $0xe8] ss:$16 sps:$4 sm:$0xff]  }
  0x4f   :  { %129 = vperm.xlu1 %2649, %v88_v24   ;;  %126 = vperm.xlu0 %2648, %v87_v25   ;;  %v3462_v24 = vld [vmem:[#allocation5 + $0xec] ss:$16 sps:$4 sm:$0xff]   ;;  %v3467_v25 = vld [vmem:[#allocation5 + $0xe0] ss:$16 sps:$4 sm:$0xff]  }
  0x53   :  { %135 = vperm.xlu1 %2649, %v90_v30   ;;  %132 = vperm.xlu0 %2648, %v89_v31  }
  0x57   :  { %141 = vperm.xlu1 %2649, %v92_v33   ;;  %138 = vperm.xlu0 %2648, %v91_v34  }
  0xba   :  { %v97_v37 = vpop.permute.xlu0 %96  ;;  %v103_v38 = vpop.permute.xlu1 %102 }
  0xbb   :  { %vm143_vm0 = vcmp.eq.s32.totalorder %v97_v37, %v3351_v36  ;;  %vm145_vm3 = vcmp.eq.s32.totalorder %v103_v38, %v3351_v36 }
  0xbc   :  { %v2450_v41 = vsel %vm143_vm0, 1.0, %v3162_v40  ;;  %v2452_v51 = vsel %vm145_vm3, 1.0, %v3162_v40 }
  0xbe   :  { %v100_v39 = vpop.permute.xlu0 %99  ;;  %v106_v46 = vpop.permute.xlu1 %105 }
  0xbf   :  { %vm144_vm1 = vcmp.eq.s32.totalorder %v100_v39, %v3351_v36  ;;  %vm146_vm4 = vcmp.eq.s32.totalorder %v106_v46, %v3351_v36 }
  0xc0   :  { %v2451_v42 = vsel %vm144_vm1, 1.0, %v3162_v40  ;;  %v2453_v52 = vsel %vm146_vm4, 1.0, %v3162_v40 }
  0xc1   :  { %v191_v44 = vpack.c.bf16 %v2451_v42, %v2450_v41  ;;  %v192_v56 = vpack.c.bf16 %v2453_v52, %v2452_v51 }
  0xc2   :  { %v112_v54 = vpop.permute.xlu1 %111  ;;  %v109_v55 = vpop.permute.xlu0 %108 }
  0xc3   :  { %2482 = vmatmul.mubr.msk.bf16.vlgmr.msra.gmra.mrb[0].mxu0 %vm295_vm2, %v191_v44  ;;  %2490 = vmatmul.mubr.msk.bf16.vlgmr.msra.gmra.mrb[0].mxu1 %vm295_vm2, %v191_v44  ;;  %vm148_vm5 = vcmp.eq.s32.totalorder %v112_v54, %v3351_v36  ;;  %vm147_vm6 = vcmp.eq.s32.totalorder %v109_v55, %v3351_v36 }
  0xc4   :  { %823 = vmatpush1.bf16.msra.mxu0 %v3357_v43  ;;  %362 = vmatprep.mubr.bf16.mxu0 %v4025_v0  ;;  %v2455_v63 = vsel %vm148_vm5, 1.0, %v3162_v40  ;;  %v2454_v1 = vsel %vm147_vm6, 1.0, %v3162_v40 }
  0xc5   :  { %475 = vmatprep.mubr.bf16.mxu1 %v4025_v0  ;;  %824 = vmatprep.subr.bf16.mxu0 %v3359_v45  ;;  %v193_v6 = vpack.c.bf16 %v2455_v63, %v2454_v1 }
  0xc6   :  { %866 = vmatpush1.bf16.msra.mxu1 %v3361_v47  ;;  %v118_v4 = vpop.permute.xlu1 %117  ;;  %v115_v5 = vpop.permute.xlu0 %114 }
  0xc7   :  { %867 = vmatprep.subr.bf16.mxu1 %v3367_v48  ;;  %vm150_vm7 = vcmp.eq.s32.totalorder %v118_v4, %v3351_v36  ;;  %vm149_vm8 = vcmp.eq.s32.totalorder %v115_v5, %v3351_v36 }
  0xc8   :  { %825 = vmatpush1.bf16.msra.mxu0 %v3371_v49  ;;  %v2457_v13 = vsel %vm150_vm7, 1.0, %v3162_v40  ;;  %v2456_v14 = vsel %vm149_vm8, 1.0, %v3162_v40 }
  0xc9   :  { %826 = vmatprep.subr.bf16.mxu0 %v3375_v50  ;;  %v194_v19 = vpack.c.bf16 %v2457_v13, %v2456_v14 }
  0xca   :  { %868 = vmatpush1.bf16.msra.mxu1 %v3380_v53  ;;  %v124_v17 = vpop.permute.xlu1 %123  ;;  %v121_v18 = vpop.permute.xlu0 %120 }
  0xcb   :  { %2483 = vmatmul.mubr.msk.bf16.gmra.mrb[4].mxu0 %vm295_vm2, %v192_v56  ;;  %2491 = vmatmul.mubr.msk.bf16.gmra.mrb[4].mxu1 %vm295_vm2, %v192_v56  ;;  %vm152_vm9 = vcmp.eq.s32.totalorder %v124_v17, %v3351_v36  ;;  %vm151_vm10 = vcmp.eq.s32.totalorder %v121_v18, %v3351_v36 }
  0xcc   :  { %372 = vmatprep.mubr.bf16.mxu0 %v4025_v0  ;;  %485 = vmatprep.mubr.bf16.mxu1 %v4025_v0  ;;  %v2459_v26 = vsel %vm152_vm9, 1.0, %v3162_v40  ;;  %v2458_v27 = vsel %vm151_vm10, 1.0, %v3162_v40 }
  0xcd   :  { %827 = vmatpush1.bf16.msra.mxu0 %v3385_v57  ;;  %869 = vmatprep.subr.bf16.mxu1 %v3387_v58  ;;  %v195_v33 = vpack.c.bf16 %v2459_v26, %v2458_v27 }
  0xce   :  { %828 = vmatprep.subr.bf16.mxu0 %v3389_v59  ;;  %870 = vmatpush1.bf16.msra.mxu1 %v3392_v60  ;;  %v130_v30 = vpop.permute.xlu1 %129  ;;  %v127_v31 = vpop.permute.xlu0 %126 }
  0xcf   :  { %871 = vmatprep.subr.bf16.mxu1 %v3398_v61  ;;  %vm154_vm11 = vcmp.eq.s32.totalorder %v130_v30, %v3351_v36  ;;  %vm153_vm12 = vcmp.eq.s32.totalorder %v127_v31, %v3351_v36 }
  0xd0   :  { %v2461_v34 = vsel %vm154_vm11, 1.0, %v3162_v40  ;;  %v2460_v37 = vsel %vm153_vm12, 1.0, %v3162_v40 }
  0xd1   :  { %829 = vmatpush1.bf16.msra.mxu0 %v3403_v62  ;;  %v196_v41 = vpack.c.bf16 %v2461_v34, %v2460_v37 }
  0xd2   :  { %830 = vmatprep.subr.bf16.mxu0 %v3409_v2  ;;  %872 = vmatpush1.bf16.msra.mxu1 %v3412_v3  ;;  %v136_v38 = vpop.permute.xlu1 %135  ;;  %v133_v39 = vpop.permute.xlu0 %132 }
  0xd3   :  { %2484 = vmatmul.mubr.msk.bf16.gmra.mrb[8].mxu0 %vm295_vm2, %v193_v6  ;;  %2492 = vmatmul.mubr.msk.bf16.gmra.mrb[8].mxu1 %vm295_vm2, %v193_v6  ;;  %vm156_vm13 = vcmp.eq.s32.totalorder %v136_v38, %v3351_v36  ;;  %vm155_vm14 = vcmp.eq.s32.totalorder %v133_v39, %v3351_v36 }
  0xd4   :  { %382 = vmatprep.mubr.bf16.mxu0 %v4025_v0  ;;  %495 = vmatprep.mubr.bf16.mxu1 %v4025_v0  ;;  %v2463_v42 = vsel %vm156_vm13, 1.0, %v3162_v40  ;;  %v2462_v44 = vsel %vm155_vm14, 1.0, %v3162_v40 }
  0xd5   :  { %831 = vmatpush1.bf16.msra.mxu0 %v3416_v7  ;;  %873 = vmatprep.subr.bf16.mxu1 %v3418_v8  ;;  %v197_v52 = vpack.c.bf16 %v2463_v42, %v2462_v44 }
  0xd6   :  { %832 = vmatprep.subr.bf16.mxu0 %v3421_v9  ;;  %874 = vmatpush1.bf16.msra.mxu1 %v3424_v10  ;;  %v142_v46 = vpop.permute.xlu1 %141  ;;  %v139_v51 = vpop.permute.xlu0 %138 }
  0xd7   :  { %875 = vmatprep.subr.bf16.mxu1 %v3430_v11  ;;  %vm158_vm15 = vcmp.eq.s32.totalorder %v142_v46, %v3351_v36  ;;  %vm157_vm0 = vcmp.eq.s32.totalorder %v139_v51, %v3351_v36  ;;  %v3163_v36 = vmov 0.0|0.0  }
  0xd8   :  { %v2465_v54 = vsel %vm158_vm15, 1.0, %v3162_v40  ;;  %v2464_v55 = vsel %vm157_vm0, 1.0, %v3162_v40 }
  0xd9   :  { %833 = vmatpush1.bf16.msra.mxu0 %v3435_v12  ;;  %v198_v56 = vpack.c.bf16 %v2465_v54, %v2464_v55 }
  0xda   :  { %834 = vmatprep.subr.bf16.mxu0 %v3441_v15  ;;  %876 = vmatpush1.bf16.msra.mxu1 %v3444_v16 }
  0xdb   :  { %2485 = vmatmul.mubr.msk.bf16.gmra.mrb[12].mxu0 %vm295_vm2, %v194_v19  ;;  %2493 = vmatmul.mubr.msk.bf16.gmra.mrb[12].mxu1 %vm295_vm2, %v194_v19 }
  0xdc   :  { %392 = vmatprep.mubr.bf16.mxu0 %v4025_v0  ;;  %505 = vmatprep.mubr.bf16.mxu1 %v4025_v0 }
  0xdd   :  { %835 = vmatpush1.bf16.msra.mxu0 %v3448_v20  ;;  %877 = vmatprep.subr.bf16.mxu1 %v3450_v21 }
  0xde   :  { %836 = vmatprep.subr.bf16.mxu0 %v3454_v22  ;;  %878 = vmatpush1.bf16.msra.mxu1 %v3456_v23 }
  0xdf   :  { %879 = vmatprep.subr.bf16.mxu1 %v3462_v24 }
  0xe1   :  { %837 = vmatpush1.bf16.msra.mxu0 %v3467_v25 }
  0xe2   :  { %880 = vmatpush1.bf16.msra.mxu1 %v3474_v28  ;;  %980 = vmatprep.subr.bf16.mxu0 %v3332_v29 }
  0xe3   :  { %2486 = vmatmul.mubr.msk.bf16.gmra.mrb[16].mxu0 %vm295_vm2, %v195_v33  ;;  %2494 = vmatmul.mubr.msk.bf16.gmra.mrb[16].mxu1 %vm295_vm2, %v195_v33 }
  0xe4   :  { %402 = vmatprep.mubr.bf16.mxu0 %v4025_v0  ;;  %515 = vmatprep.mubr.bf16.mxu1 %v4025_v0 }
  0xe5   :  { %1023 = vmatprep.subr.bf16.mxu1 %v3341_v32 }
  0xeb   :  { %2487 = vmatmul.mubr.msk.bf16.gmra.mrb[20].mxu0 %vm295_vm2, %v196_v41  ;;  %2495 = vmatmul.mubr.msk.bf16.gmra.mrb[20].mxu1 %vm295_vm2, %v196_v41 }
  0xec   :  { %412 = vmatprep.mubr.bf16.mxu0 %v4025_v0  ;;  %525 = vmatprep.mubr.bf16.mxu1 %v4025_v0 }
  0xf3   :  { %2488 = vmatmul.mubr.msk.bf16.gmra.mrb[24].mxu0 %vm295_vm2, %v197_v52  ;;  %2496 = vmatmul.mubr.msk.bf16.gmra.mrb[24].mxu1 %vm295_vm2, %v197_v52 }
  0xf4   :  { %422 = vmatprep.mubr.bf16.mxu0 %v4025_v0  ;;  %535 = vmatprep.mubr.bf16.mxu1 %v4025_v0 }
  0xfb   :  { %2489 = vmatmul.mubr.msk.bf16.gmra.mrb[28].mxu0 %vm295_vm2, %v198_v56  ;;  %2497 = vmatmul.mubr.msk.bf16.gmra.mrb[28].mxu1 %vm295_vm2, %v198_v56 }
  0xfc   :  { %854 = vmatprep.mubr.bf16.mxu0 %v4025_v0  ;;  %897 = vmatprep.mubr.bf16.mxu1 %v4025_v0 }
 0x103   :  { %855 = vmatmul.mubr.bf16.vlgmr.msra.gmra.mrb[32].mxu0 %v3163_v36  ;;  %898 = vmatmul.mubr.bf16.vlgmr.msra.gmra.mrb[32].mxu1 %v3163_v36 }
 0x104   :  { %981 = vmatpush1.bf16.msra.mxu0 %v3357_v43  ;;  %1024 = vmatpush1.bf16.msra.mxu1 %v3361_v47 }
 0x105   :  { %982 = vmatprep.subr.bf16.mxu0 %v3359_v45  ;;  %1025 = vmatprep.subr.bf16.mxu1 %v3367_v48 }
 0x106   :  { %1012 = vmatprep.mubr.bf16.mxu0 %v4025_v0  ;;  %1055 = vmatprep.mubr.bf16.mxu1 %v4025_v0 }
 0x108   :  { %983 = vmatpush1.bf16.msra.mxu0 %v3371_v49  ;;  %1026 = vmatpush1.bf16.msra.mxu1 %v3380_v53 }
 0x109   :  { %984 = vmatprep.subr.bf16.mxu0 %v3375_v50  ;;  %1027 = vmatprep.subr.bf16.mxu1 %v3387_v58 }
 0x10c   :  { %985 = vmatpush1.bf16.msra.mxu0 %v3385_v57  ;;  %1028 = vmatpush1.bf16.msra.mxu1 %v3392_v60 }
 0x10d   :  { %986 = vmatprep.subr.bf16.mxu0 %v3389_v59  ;;  %1029 = vmatprep.subr.bf16.mxu1 %v3398_v61 }
 0x110   :  { %987 = vmatpush1.bf16.msra.mxu0 %v3403_v62  ;;  %1030 = vmatpush1.bf16.msra.mxu1 %v3412_v3 }
 0x111   :  { %988 = vmatprep.subr.bf16.mxu0 %v3409_v2  ;;  %1031 = vmatprep.subr.bf16.mxu1 %v3418_v8 }
 0x114   :  { %989 = vmatpush1.bf16.msra.mxu0 %v3416_v7  ;;  %1032 = vmatpush1.bf16.msra.mxu1 %v3424_v10 }
 0x115   :  { %990 = vmatprep.subr.bf16.mxu0 %v3421_v9  ;;  %1033 = vmatprep.subr.bf16.mxu1 %v3430_v11 }
 0x118   :  { %991 = vmatpush1.bf16.msra.mxu0 %v3435_v12  ;;  %1034 = vmatpush1.bf16.msra.mxu1 %v3444_v16 }
 0x119   :  { %992 = vmatprep.subr.bf16.mxu0 %v3441_v15  ;;  %1035 = vmatprep.subr.bf16.mxu1 %v3450_v21 }
 0x11c   :  { %993 = vmatpush1.bf16.msra.mxu0 %v3448_v20  ;;  %1036 = vmatpush1.bf16.msra.mxu1 %v3456_v23 }
 0x11d   :  { %994 = vmatprep.subr.bf16.mxu0 %v3454_v22  ;;  %1037 = vmatprep.subr.bf16.mxu1 %v3462_v24 }
 0x120   :  { %995 = vmatpush1.bf16.msra.mxu0 %v3467_v25  ;;  %1038 = vmatpush1.bf16.msra.mxu1 %v3474_v28 }
 0x121   :  { %1138 = vmatprep.subr.bf16.mxu0 %v3332_v29  ;;  %1181 = vmatprep.subr.bf16.mxu1 %v3341_v32 }
 0x196   :  { %v354_v40 = vpop.f32.mrb[0].mxu0  ;;  %v467_v63 = vpop.f32.mrb[0].mxu1 }
 0x197   :  { %v356_v1 = vpop.f32.mrb[1].mxu0  ;;  %v469_v4 = vpop.f32.mrb[1].mxu1 }
 0x198   :  { %v358_v5 = vpop.f32.mrb[2].mxu0  ;;  %v471_v6 = vpop.f32.mrb[2].mxu1 }
 0x199   :  { %v3543_v13 = vpack.c.bf16 %v358_v5, %v354_v40  ;;  %v3545_v14 = vpack.c.bf16 %v471_v6, %v467_v63  ;;  %v360_v17 = vpop.f32.mrb[3].mxu0  ;;  %v473_v18 = vpop.f32.mrb[3].mxu1 }
 0x19a   :  { %v3547_v19 = vpack.c.bf16 %v360_v17, %v356_v1  ;;  %v3549_v26 = vpack.c.bf16 %v473_v18, %v469_v4 }
 0x19e   :  { %v364_v27 = vpop.f32.mrb[4].mxu0  ;;  %v477_v30 = vpop.f32.mrb[4].mxu1 }
 0x19f   :  { %v366_v31 = vpop.f32.mrb[5].mxu0  ;;  %v479_v33 = vpop.f32.mrb[5].mxu1 }
 0x1a0   :  { %v368_v34 = vpop.f32.mrb[6].mxu0  ;;  %v481_v37 = vpop.f32.mrb[6].mxu1 }
 0x1a1   :  { %v3551_v38 = vpack.c.bf16 %v368_v34, %v364_v27  ;;  %v3553_v39 = vpack.c.bf16 %v481_v37, %v477_v30  ;;  %v370_v41 = vpop.f32.mrb[7].mxu0  ;;  %v483_v42 = vpop.f32.mrb[7].mxu1 }
 0x1a2   :  { %v3555_v44 = vpack.c.bf16 %v370_v41, %v366_v31  ;;  %v3557_v46 = vpack.c.bf16 %v483_v42, %v479_v33 }
 0x1a6   :  { %v374_v51 = vpop.f32.mrb[8].mxu0  ;;  %v487_v52 = vpop.f32.mrb[8].mxu1 }
 0x1a7   :  { %v376_v54 = vpop.f32.mrb[9].mxu0  ;;  %v489_v55 = vpop.f32.mrb[9].mxu1 }
 0x1a8   :  { %v378_v56 = vpop.f32.mrb[10].mxu0  ;;  %v491_v36 = vpop.f32.mrb[10].mxu1 }
 0x1a9   :  { %v3559_v40 = vpack.c.bf16 %v378_v56, %v374_v51  ;;  %v3561_v63 = vpack.c.bf16 %v491_v36, %v487_v52  ;;  %v380_v1 = vpop.f32.mrb[11].mxu0  ;;  %v493_v4 = vpop.f32.mrb[11].mxu1 }
 0x1aa   :  { %v3563_v5 = vpack.c.bf16 %v380_v1, %v376_v54  ;;  %v3565_v6 = vpack.c.bf16 %v493_v4, %v489_v55 }
 0x1ac   :  { %4049 = vst [vmem:[#allocation15_spill] sm:$0xff] %v3563_v5  ;;  %4050 = vst [vmem:[#allocation16_spill] sm:$0xff] %v3565_v6 }
 0x1ae   :  { %v384_v17 = vpop.f32.mrb[12].mxu0  ;;  %v497_v18 = vpop.f32.mrb[12].mxu1 }
 0x1af   :  { %v386_v27 = vpop.f32.mrb[13].mxu0  ;;  %v499_v30 = vpop.f32.mrb[13].mxu1 }
 0x1b0   :  { %v388_v31 = vpop.f32.mrb[14].mxu0  ;;  %v501_v33 = vpop.f32.mrb[14].mxu1 }
 0x1b1   :  { %v3567_v34 = vpack.c.bf16 %v388_v31, %v384_v17  ;;  %v3569_v37 = vpack.c.bf16 %v501_v33, %v497_v18  ;;  %v390_v41 = vpop.f32.mrb[15].mxu0  ;;  %v503_v42 = vpop.f32.mrb[15].mxu1 }
 0x1b2   :  { %v3571_v51 = vpack.c.bf16 %v390_v41, %v386_v27  ;;  %v3573_v52 = vpack.c.bf16 %v503_v42, %v499_v30 }
 0x1b3   :  { %4051 = vst [vmem:[#allocation17_spill] sm:$0xff] %v3567_v34  ;;  %4052 = vst [vmem:[#allocation18_spill] sm:$0xff] %v3569_v37 }
 0x1b4   :  { %4053 = vst [vmem:[#allocation19_spill] sm:$0xff] %v3571_v51  ;;  %4054 = vst [vmem:[#allocation20_spill] sm:$0xff] %v3573_v52 }
 0x1b6   :  { %v394_v54 = vpop.f32.mrb[16].mxu0  ;;  %v507_v56 = vpop.f32.mrb[16].mxu1 }
 0x1b7   :  { %v396_v55 = vpop.f32.mrb[17].mxu0  ;;  %v509_v36 = vpop.f32.mrb[17].mxu1 }
 0x1b8   :  { %v398_v1 = vpop.f32.mrb[18].mxu0  ;;  %v511_v4 = vpop.f32.mrb[18].mxu1 }
 0x1b9   :  { %v3575_v35 = vpack.c.bf16 %v398_v1, %v394_v54  ;;  %v3577_v0 = vpack.c.bf16 %v511_v4, %v507_v56  ;;  %v400_v17 = vpop.f32.mrb[19].mxu0  ;;  %v513_v31 = vpop.f32.mrb[19].mxu1 }
 0x1ba   :  { %v3579_v18 = vpack.c.bf16 %v400_v17, %v396_v55  ;;  %v3581_v33 = vpack.c.bf16 %v513_v31, %v509_v36 }
 0x1bb   :  { %4055 = vst [vmem:[#allocation21_spill] sm:$0xff] %v3575_v35  ;;  %4056 = vst [vmem:[#allocation22_spill] sm:$0xff] %v3577_v0 }
 0x1bc   :  { %4057 = vst [vmem:[#allocation23_spill] sm:$0xff] %v3579_v18  ;;  %4058 = vst [vmem:[#allocation24_spill] sm:$0xff] %v3581_v33 }
 0x1be   :  { %v404_v27 = vpop.f32.mrb[20].mxu0  ;;  %v517_v41 = vpop.f32.mrb[20].mxu1 }
 0x1bf   :  { %v406_v30 = vpop.f32.mrb[21].mxu0  ;;  %v519_v42 = vpop.f32.mrb[21].mxu1 }
 0x1c0   :  { %v408_v52 = vpop.f32.mrb[22].mxu0  ;;  %v521_v51 = vpop.f32.mrb[22].mxu1 }
 0x1c1   :  { %v3583_v37 = vpack.c.bf16 %v408_v52, %v404_v27  ;;  %v3585_v34 = vpack.c.bf16 %v521_v51, %v517_v41  ;;  %v410_v54 = vpop.f32.mrb[23].mxu0  ;;  %v523_v1 = vpop.f32.mrb[23].mxu1 }
 0x1c2   :  { %v3587_v56 = vpack.c.bf16 %v410_v54, %v406_v30  ;;  %v3589_v4 = vpack.c.bf16 %v523_v1, %v519_v42 }
 0x1c3   :  { %4059 = vst [vmem:[#allocation25_spill] sm:$0xff] %v3583_v37  ;;  %4060 = vst [vmem:[#allocation26_spill] sm:$0xff] %v3585_v34 }
 0x1c4   :  { %4061 = vst [vmem:[#allocation27_spill] sm:$0xff] %v3587_v56  ;;  %4062 = vst [vmem:[#allocation28_spill] sm:$0xff] %v3589_v4 }
 0x1c6   :  { %v414_v55 = vpop.f32.mrb[24].mxu0  ;;  %v527_v17 = vpop.f32.mrb[24].mxu1 }
 0x1c7   :  { %v416_v36 = vpop.f32.mrb[25].mxu0  ;;  %v529_v31 = vpop.f32.mrb[25].mxu1 }
 0x1c8   :  { %v418_v33 = vpop.f32.mrb[26].mxu0  ;;  %v531_v18 = vpop.f32.mrb[26].mxu1 }
 0x1c9   :  { %v3591_v0 = vpack.c.bf16 %v418_v33, %v414_v55  ;;  %v3593_v35 = vpack.c.bf16 %v531_v18, %v527_v17  ;;  %v420_v52 = vpop.f32.mrb[27].mxu0  ;;  %v533_v27 = vpop.f32.mrb[27].mxu1 }
 0x1ca   :  { %v3595_v51 = vpack.c.bf16 %v420_v52, %v416_v36  ;;  %v3597_v41 = vpack.c.bf16 %v533_v27, %v529_v31  ;;  %v621_v36 = vunpack.c.l.bf16 %v3543_v13  ;;  %v623_v31 = vunpack.c.l.bf16 %v3545_v14 }
 0x1cb   :  { %4063 = vst [vmem:[#allocation29_spill] sm:$0xff] %v3591_v0  ;;  %4064 = vst [vmem:[#allocation30_spill] sm:$0xff] %v3593_v35 }
 0x1cc   :  { %4065 = vst [vmem:[#allocation31_spill] sm:$0xff] %v3595_v51  ;;  %4066 = vst [vmem:[#allocation32_spill] sm:$0xff] %v3597_v41  ;;  %v622_v41 = vunpack.c.l.bf16 %v3547_v19  ;;  %v624_v51 = vunpack.c.l.bf16 %v3549_v26 }
 0x1ce   :  { %v424_v30 = vpop.f32.mrb[28].mxu0  ;;  %v537_v54 = vpop.f32.mrb[28].mxu1 }
 0x1cf   :  { %v426_v42 = vpop.f32.mrb[29].mxu0  ;;  %v539_v1 = vpop.f32.mrb[29].mxu1 }
 0x1d0   :  { %v428_v4 = vpop.f32.mrb[30].mxu0  ;;  %v541_v56 = vpop.f32.mrb[30].mxu1 }
 0x1d1   :  { %v3599_v34 = vpack.c.bf16 %v428_v4, %v424_v30  ;;  %v3601_v37 = vpack.c.bf16 %v541_v56, %v537_v54  ;;  %v430_v33 = vpop.f32.mrb[31].mxu0  ;;  %v543_v55 = vpop.f32.mrb[31].mxu1 }
 0x1d2   :  { %v3603_v18 = vpack.c.bf16 %v430_v33, %v426_v42  ;;  %v3605_v17 = vpack.c.bf16 %v543_v55, %v539_v1  ;;  %v627_v42 = vunpack.c.h.bf16 %v3545_v14 }
 0x1d3   :  { %4067 = vst [vmem:[#allocation33_spill] sm:$0xff] %v3599_v34  ;;  %4068 = vst [vmem:[#allocation34_spill] sm:$0xff] %v3601_v37  ;;  %v625_v37 = vunpack.c.h.bf16 %v3543_v13  ;;  %v628_v34 = vunpack.c.h.bf16 %v3549_v26 }
 0x1d4   :  { %4069 = vst [vmem:[#allocation35_spill] sm:$0xff] %v3603_v18  ;;  %4070 = vst [vmem:[#allocation36_spill] sm:$0xff] %v3605_v17  ;;  %v626_v18 = vunpack.c.h.bf16 %v3547_v19 }
 0x1d6   :  { %v856_v52 = vpop.f32.mrb[32].mxu0  ;;  %v899_v27 = vpop.f32.mrb[32].mxu1 }
 0x1d7   :  { %v908_v4 = vadd.f32 %v856_v52, %v621_v36  ;;  %v910_v30 = vadd.f32 %v899_v27, %v623_v31  ;;  %v858_v56 = vpop.f32.mrb[33].mxu0  ;;  %v901_v54 = vpop.f32.mrb[33].mxu1 }
 0x1d8   :  { %v909_v1 = vadd.f32 %v858_v56, %v622_v41  ;;  %v911_v33 = vadd.f32 %v901_v54, %v624_v51  ;;  %v860_v55 = vpop.f32.mrb[34].mxu0  ;;  %v903_v17 = vpop.f32.mrb[34].mxu1 }
 0x1d9   :  { %v2530_v35 = vmul.f32 -1.442695, %v908_v4  ;;  %v912_v0 = vadd.f32 %v860_v55, %v625_v37  ;;  %v914_v6 = vadd.f32 %v903_v17, %v627_v42  ;;  %v862_v5 = vpop.f32.mrb[35].mxu0  ;;  %v905_v36 = vpop.f32.mrb[35].mxu1 }
 0x1da   :  { %v2532_v31 = vmul.f32 -1.442695, %v909_v1  ;;  %v913_v52 = vadd.f32 %v862_v5, %v626_v18  ;;  %v915_v27 = vadd.f32 %v905_v36, %v628_v34  ;;  %v2534_v51 = vmul.f32 -1.442695, %v911_v33 }
 0x1db   :  { %2762 = vpow2.f32 %v2530_v35  ;;  %v2531_v13 = vmul.f32 -1.442695, %v912_v0 }
 0x1dc   :  { %2764 = vpow2.f32 %v2532_v31  ;;  %v2533_v14 = vmul.f32 -1.442695, %v913_v52  ;;  %v2535_v26 = vmul.f32 -1.442695, %v915_v27 }
 0x1dd   :  { %2766 = vpow2.f32 %v2531_v13 }
 0x1de   :  { %2768 = vpow2.f32 %v2533_v14 }
 0x1df   :  { %2770 = vtanh.f32 %v910_v30 }
 0x1e0   :  { %2772 = vpow2.f32 %v2534_v51 }
 0x1e1   :  { %2774 = vtanh.f32 %v914_v6 }
 0x1e5   :  { %v2763_v41 = vpop.eup %2762 }
 0x1e6   :  { %v2765_v19 = vpop.eup %2764  ;;  %v922_v56 = vadd.f32 1.0, %v2763_v41 }
 0x1e7   :  { %v934_v37 = vadd.f32 1.0, %v2765_v19  ;;  %v2767_v17 = vpop.eup %2766 }
 0x1e8   :  { %2776 = vrcp.f32 %v922_v56  ;;  %v923_v5 = vadd.f32 1.0, %v2767_v17  ;;  %v2769_v34 = vpop.eup %2768 }
 0x1e9   :  { %2778 = vrcp.f32 %v934_v37  ;;  %v935_v0 = vadd.f32 1.0, %v2769_v34  ;;  %v2771_v35 = vpop.eup %2770  ;;  %v971_v34 = vunpack.c.l.bf16 %v3551_v38 }
 0x1ea   :  { %2780 = vpow2.f32 %v2535_v26  ;;  %v2773_v18 = vpop.eup %2772 }
 0x1eb   :  { %2782 = vrcp.f32 %v923_v5  ;;  %v2775_v4 = vpop.eup %2774  ;;  %v948_v36 = vadd.f32 1.0, %v2773_v18  ;;  %v4071_v5 = vmov 0  }
 0x1ec   :  { %2784 = vrcp.f32 %v935_v0  ;;  %v973_v0 = vunpack.c.l.bf16 %v3553_v39 }
 0x1ed   :  { %2786 = vrcp.f32 %v948_v36 }
 0x1f2   :  { %v2777_v54 = vpop.eup %2776 }
 0x1f3   :  { %v2779_v30 = vpop.eup %2778  ;;  %v956_v42 = vmul.f32 %v2777_v54, %v2771_v35  ;;  %v974_v54 = vunpack.c.l.bf16 %v3557_v46 }
 0x1f4   :  { %v2781_v1 = vpop.eup %2780  ;;  %v954_v33 = vmul.f32 0.0, %v2779_v30 }
 0x1f5   :  { %v2783_v55 = vpop.eup %2782  ;;  %v949_v27 = vadd.f32 1.0, %v2781_v1 }
 0x1f6   :  { %v3615_v6 = vadd.f32 %v956_v42, %v954_v33  ;;  %v957_v31 = vmul.f32 %v2783_v55, %v2775_v4  ;;  %v2785_v52 = vpop.eup %2784  ;;  %v972_v4 = vunpack.c.l.bf16 %v3555_v44  ;;  %v975_v55 = vunpack.c.h.bf16 %v3551_v38 }
 0x1f7   :  { %v955_v13 = vmul.f32 0.0, %v2785_v52  ;;  %v2787_v51 = vpop.eup %2786 }
 0x1f8   :  { %2788 = vtanh.f32 %v3615_v6 }
 0x1f9   :  { %v3618_v14 = vadd.f32 %v957_v31, %v955_v13  ;;  %2790 = vrcp.f32 %v949_v27  ;;  %v976_v27 = vunpack.c.h.bf16 %v3555_v44  ;;  %v978_v13 = vunpack.c.h.bf16 %v3557_v46 }
 0x1fb   :  { %2792 = vtanh.f32 %v3618_v14 }
 0x202   :  { %v2789_v41 = vpop.eup %2788 }
 0x203   :  { %v2791_v19 = vpop.eup %2790  ;;  %v962_v26 = vmul.f32 %v2789_v41, %v2787_v51 }
 0x205   :  { %v2793_v56 = vpop.eup %2792 }
 0x206   :  { %v963_v37 = vmul.f32 %v2793_v56, %v2791_v19 }
 0x208   :  { %v979_v17 = vpack.c.bf16 %v963_v37, %v962_v26 }
 0x20a   :  { %1013 = vmatmul.mubr.bf16.vlgmr.msra.gmra.mrb[36].mxu0 %v979_v17  ;;  %1056 = vmatmul.mubr.bf16.vlgmr.msra.gmra.mrb[36].mxu1 %v979_v17 }
 0x20b   :  { %1139 = vmatpush1.bf16.msra.mxu0 %v3357_v43  ;;  %1182 = vmatpush1.bf16.msra.mxu1 %v3361_v47 }
 0x20c   :  { %1140 = vmatprep.subr.bf16.mxu0 %v3359_v45  ;;  %1183 = vmatprep.subr.bf16.mxu1 %v3367_v48 }
 0x20d   :  { %1170 = vmatprep.mubr.bf16.mxu0 %v4071_v5  ;;  %1213 = vmatprep.mubr.bf16.mxu1 %v4071_v5 }
 0x20f   :  { %1141 = vmatpush1.bf16.msra.mxu0 %v3371_v49  ;;  %1184 = vmatpush1.bf16.msra.mxu1 %v3380_v53 }
 0x210   :  { %1142 = vmatprep.subr.bf16.mxu0 %v3375_v50  ;;  %1185 = vmatprep.subr.bf16.mxu1 %v3387_v58 }
 0x213   :  { %1143 = vmatpush1.bf16.msra.mxu0 %v3385_v57  ;;  %1186 = vmatpush1.bf16.msra.mxu1 %v3392_v60 }
 0x214   :  { %1144 = vmatprep.subr.bf16.mxu0 %v3389_v59  ;;  %1187 = vmatprep.subr.bf16.mxu1 %v3398_v61 }
 0x217   :  { %1145 = vmatpush1.bf16.msra.mxu0 %v3403_v62  ;;  %1188 = vmatpush1.bf16.msra.mxu1 %v3412_v3 }
 0x218   :  { %1146 = vmatprep.subr.bf16.mxu0 %v3409_v2  ;;  %1189 = vmatprep.subr.bf16.mxu1 %v3418_v8 }
 0x21b   :  { %1147 = vmatpush1.bf16.msra.mxu0 %v3416_v7  ;;  %1190 = vmatpush1.bf16.msra.mxu1 %v3424_v10 }
 0x21c   :  { %1148 = vmatprep.subr.bf16.mxu0 %v3421_v9  ;;  %1191 = vmatprep.subr.bf16.mxu1 %v3430_v11 }
 0x21f   :  { %1149 = vmatpush1.bf16.msra.mxu0 %v3435_v12  ;;  %1192 = vmatpush1.bf16.msra.mxu1 %v3444_v16 }
 0x220   :  { %1150 = vmatprep.subr.bf16.mxu0 %v3441_v15  ;;  %1193 = vmatprep.subr.bf16.mxu1 %v3450_v21 }
 0x223   :  { %1151 = vmatpush1.bf16.msra.mxu0 %v3448_v20  ;;  %1194 = vmatpush1.bf16.msra.mxu1 %v3456_v23 }
 0x224   :  { %1152 = vmatprep.subr.bf16.mxu0 %v3454_v22  ;;  %1195 = vmatprep.subr.bf16.mxu1 %v3462_v24 }
 0x227   :  { %1153 = vmatpush1.bf16.msra.mxu0 %v3467_v25  ;;  %1196 = vmatpush1.bf16.msra.mxu1 %v3474_v28 }
 0x228   :  { %1296 = vmatprep.subr.bf16.mxu0 %v3332_v29  ;;  %1339 = vmatprep.subr.bf16.mxu1 %v3341_v32  ;;  %v977_v29 = vunpack.c.h.bf16 %v3553_v39 }
 0x2dd   :  { %v1014_v35 = vpop.f32.mrb[36].mxu0  ;;  %v1057_v18 = vpop.f32.mrb[36].mxu1 }
 0x2de   :  { %v1066_v30 = vadd.f32 %v1014_v35, %v971_v34  ;;  %v1068_v42 = vadd.f32 %v1057_v18, %v973_v0  ;;  %v1016_v1 = vpop.f32.mrb[37].mxu0  ;;  %v1059_v33 = vpop.f32.mrb[37].mxu1 }
 0x2df   :  { %v1067_v36 = vadd.f32 %v1016_v1, %v972_v4  ;;  %v1069_v32 = vadd.f32 %v1059_v33, %v974_v54  ;;  %v1018_v31 = vpop.f32.mrb[38].mxu0  ;;  %v1061_v52 = vpop.f32.mrb[38].mxu1 }
 0x2e0   :  { %v2536_v51 = vmul.f32 -1.442695, %v1066_v30  ;;  %v1070_v41 = vadd.f32 %v1018_v31, %v975_v55  ;;  %v1072_v19 = vadd.f32 %v1061_v52, %v977_v29  ;;  %v1020_v56 = vpop.f32.mrb[39].mxu0  ;;  %v1063_v26 = vpop.f32.mrb[39].mxu1 }
 0x2e1   :  { %v2538_v37 = vmul.f32 -1.442695, %v1067_v36  ;;  %v1071_v17 = vadd.f32 %v1020_v56, %v976_v27  ;;  %v1073_v34 = vadd.f32 %v1063_v26, %v978_v13  ;;  %v2540_v0 = vmul.f32 -1.442695, %v1069_v32 }
 0x2e2   :  { %2794 = vpow2.f32 %v2536_v51  ;;  %v2537_v38 = vmul.f32 -1.442695, %v1070_v41 }
 0x2e3   :  { %2796 = vpow2.f32 %v2538_v37  ;;  %v2539_v39 = vmul.f32 -1.442695, %v1071_v17  ;;  %v2541_v46 = vmul.f32 -1.442695, %v1073_v34 }
 0x2e4   :  { %2798 = vpow2.f32 %v2537_v38 }
 0x2e5   :  { %2800 = vpow2.f32 %v2539_v39 }
 0x2e6   :  { %2802 = vtanh.f32 %v1068_v42 }
 0x2e7   :  { %2804 = vpow2.f32 %v2540_v0 }
 0x2e8   :  { %2806 = vtanh.f32 %v1072_v19 }
 0x2ec   :  { %v2795_v35 = vpop.eup %2794 }
 0x2ed   :  { %v2797_v44 = vpop.eup %2796  ;;  %v1080_v18 = vadd.f32 1.0, %v2795_v35 }
 0x2ee   :  { %v1092_v4 = vadd.f32 1.0, %v2797_v44  ;;  %v2799_v54 = vpop.eup %2798 }
 0x2ef   :  { %2808 = vrcp.f32 %v1080_v18  ;;  %v1081_v30 = vadd.f32 1.0, %v2799_v54  ;;  %v2801_v1 = vpop.eup %2800 }
 0x2f0   :  { %2810 = vrcp.f32 %v1092_v4  ;;  %v1093_v33 = vadd.f32 1.0, %v2801_v1  ;;  %v2803_v55 = vpop.eup %2802 }
 0x2f1   :  { %2812 = vpow2.f32 %v2541_v46  ;;  %v2805_v29 = vpop.eup %2804 }
 0x2f2   :  { %2814 = vrcp.f32 %v1081_v30  ;;  %v2807_v36 = vpop.eup %2806  ;;  %v1106_v51 = vadd.f32 1.0, %v2805_v29 }
 0x2f3   :  { %2816 = vrcp.f32 %v1093_v33 }
 0x2f4   :  { %2818 = vrcp.f32 %v1106_v51 }
 0x2f9   :  { %v2809_v32 = vpop.eup %2808 }
 0x2fa   :  { %v2811_v42 = vpop.eup %2810  ;;  %v1114_v31 = vmul.f32 %v2809_v32, %v2803_v55 }
 0x2fb   :  { %v2813_v52 = vpop.eup %2812  ;;  %v1112_v27 = vmul.f32 %v2811_v42, %v3615_v6 }
 0x2fc   :  { %v2815_v13 = vpop.eup %2814  ;;  %v1107_v26 = vadd.f32 1.0, %v2813_v52 }
 0x2fd   :  { %v3664_v41 = vadd.f32 %v1114_v31, %v1112_v27  ;;  %v1115_v19 = vmul.f32 %v2815_v13, %v2807_v36  ;;  %v2817_v56 = vpop.eup %2816 }
 0x2fe   :  { %v1113_v37 = vmul.f32 %v2817_v56, %v3618_v14  ;;  %v2819_v34 = vpop.eup %2818 }
 0x2ff   :  { %2820 = vtanh.f32 %v3664_v41 }
 0x300   :  { %v3668_v17 = vadd.f32 %v1115_v19, %v1113_v37  ;;  %2822 = vrcp.f32 %v1107_v26 }
 0x302   :  { %2824 = vtanh.f32 %v3668_v17 }
 0x309   :  { %v2821_v38 = vpop.eup %2820 }
 0x30a   :  { %v2823_v6 = vpop.eup %2822  ;;  %v1120_v0 = vmul.f32 %v2821_v38, %v2819_v34 }
 0x30c   :  { %v2825_v39 = vpop.eup %2824 }
 0x30d   :  { %v1121_v35 = vmul.f32 %v2825_v39, %v2823_v6 }
 0x30f   :  { %v1137_v44 = vpack.c.bf16 %v1121_v35, %v1120_v0 }
 0x311   :  { %1171 = vmatmul.mubr.bf16.vlgmr.msra.gmra.mrb[40].mxu0 %v1137_v44  ;;  %1214 = vmatmul.mubr.bf16.vlgmr.msra.gmra.mrb[40].mxu1 %v1137_v44 }
 0x312   :  { %1297 = vmatpush1.bf16.msra.mxu0 %v3357_v43  ;;  %1340 = vmatpush1.bf16.msra.mxu1 %v3361_v47  ;;  %v3703_v43 = vld [vmem:[#allocation5 + $0x4] ss:$16 sps:$4 sm:$0xff]   ;;  %v1129_v47 = vunpack.c.l.bf16 %v3559_v40 }
 0x313   :  { %1298 = vmatprep.subr.bf16.mxu0 %v3359_v45  ;;  %1341 = vmatprep.subr.bf16.mxu1 %v3367_v48  ;;  %v3706_v45 = vld [vmem:[#allocation5 + $0xc] ss:$16 sps:$4 sm:$0xff]   ;;  %v1131_v48 = vunpack.c.l.bf16 %v3561_v63 }
 0x314   :  { %1328 = vmatprep.mubr.bf16.mxu0 %v4071_v5  ;;  %1371 = vmatprep.mubr.bf16.mxu1 %v4071_v5 }
 0x316   :  { %1299 = vmatpush1.bf16.msra.mxu0 %v3371_v49  ;;  %1342 = vmatpush1.bf16.msra.mxu1 %v3380_v53  ;;  %v4072_v53 = vld [vmem:[#allocation15_spill] sm:$0xff] }
 0x317   :  { %1300 = vmatprep.subr.bf16.mxu0 %v3375_v50  ;;  %1343 = vmatprep.subr.bf16.mxu1 %v3387_v58  ;;  %v4073_v58 = vld [vmem:[#allocation16_spill] sm:$0xff] }
 0x31a   :  { %1301 = vmatpush1.bf16.msra.mxu0 %v3385_v57  ;;  %1344 = vmatpush1.bf16.msra.mxu1 %v3392_v60  ;;  %v1130_v57 = vunpack.c.l.bf16 %v4072_v53 }
 0x31b   :  { %1302 = vmatprep.subr.bf16.mxu0 %v3389_v59  ;;  %1345 = vmatprep.subr.bf16.mxu1 %v3398_v61  ;;  %v1132_v59 = vunpack.c.l.bf16 %v4073_v58 }
 0x31e   :  { %1303 = vmatpush1.bf16.msra.mxu0 %v3403_v62  ;;  %1346 = vmatpush1.bf16.msra.mxu1 %v3412_v3  ;;  %v1133_v3 = vunpack.c.h.bf16 %v3559_v40 }
 0x31f   :  { %1304 = vmatprep.subr.bf16.mxu0 %v3409_v2  ;;  %1347 = vmatprep.subr.bf16.mxu1 %v3418_v8 }
 0x322   :  { %1305 = vmatpush1.bf16.msra.mxu0 %v3416_v7  ;;  %1348 = vmatpush1.bf16.msra.mxu1 %v3424_v10  ;;  %v1135_v7 = vunpack.c.h.bf16 %v3561_v63 }
 0x323   :  { %1306 = vmatprep.subr.bf16.mxu0 %v3421_v9  ;;  %1349 = vmatprep.subr.bf16.mxu1 %v3430_v11 }
 0x326   :  { %1307 = vmatpush1.bf16.msra.mxu0 %v3435_v12  ;;  %1350 = vmatpush1.bf16.msra.mxu1 %v3444_v16  ;;  %v1134_v12 = vunpack.c.h.bf16 %v4072_v53  ;;  %v3731_v53 = vld [vmem:[#allocation5 + $0x24] ss:$16 sps:$4 sm:$0xff]  }
 0x327   :  { %1308 = vmatprep.subr.bf16.mxu0 %v3441_v15  ;;  %1351 = vmatprep.subr.bf16.mxu1 %v3450_v21  ;;  %v1136_v15 = vunpack.c.h.bf16 %v4073_v58  ;;  %v3739_v58 = vld [vmem:[#allocation5 + $0x20] ss:$16 sps:$4 sm:$0xff]  }
 0x32a   :  { %1309 = vmatpush1.bf16.msra.mxu0 %v3448_v20  ;;  %1352 = vmatpush1.bf16.msra.mxu1 %v3456_v23 }
 0x32b   :  { %1310 = vmatprep.subr.bf16.mxu0 %v3454_v22  ;;  %1353 = vmatprep.subr.bf16.mxu1 %v3462_v24 }
 0x32e   :  { %1311 = vmatpush1.bf16.msra.mxu0 %v3467_v25  ;;  %1354 = vmatpush1.bf16.msra.mxu1 %v3474_v28 }
 0x32f   :  { %1454 = vmatprep.subr.bf16.mxu0 %v3703_v43  ;;  %1497 = vmatprep.subr.bf16.mxu1 %v3706_v45 }
 0x3e4   :  { %v1172_v49 = vpop.f32.mrb[40].mxu0  ;;  %v1215_v50 = vpop.f32.mrb[40].mxu1 }
 0x3e5   :  { %v1224_v60 = vadd.f32 %v1172_v49, %v1129_v47  ;;  %v1226_v61 = vadd.f32 %v1215_v50, %v1131_v48  ;;  %v1174_v62 = vpop.f32.mrb[41].mxu0  ;;  %v1217_v2 = vpop.f32.mrb[41].mxu1  ;;  %v3725_v50 = vld [vmem:[#allocation5] ss:$16 sps:$4 sm:$0xff]  }
 0x3e6   :  { %v1225_v8 = vadd.f32 %v1174_v62, %v1130_v57  ;;  %v1227_v9 = vadd.f32 %v1217_v2, %v1132_v59  ;;  %v1176_v10 = vpop.f32.mrb[42].mxu0  ;;  %v1219_v11 = vpop.f32.mrb[42].mxu1  ;;  %v3734_v57 = vld [vmem:[#allocation5 + $0x2c] ss:$16 sps:$4 sm:$0xff]   ;;  %v3742_v59 = vld [vmem:[#allocation5 + $0x28] ss:$16 sps:$4 sm:$0xff]  }
 0x3e7   :  { %v2542_v16 = vmul.f32 -1.442695, %v1224_v60  ;;  %v1228_v20 = vadd.f32 %v1176_v10, %v1133_v3  ;;  %v1230_v21 = vadd.f32 %v1219_v11, %v1135_v7  ;;  %v1178_v22 = vpop.f32.mrb[43].mxu0  ;;  %v1221_v23 = vpop.f32.mrb[43].mxu1  ;;  %v3745_v60 = vld [vmem:[#allocation5 + $0x44] ss:$16 sps:$4 sm:$0xff]  }
 0x3e8   :  { %v2544_v24 = vmul.f32 -1.442695, %v1225_v8  ;;  %v1229_v25 = vadd.f32 %v1178_v22, %v1134_v12  ;;  %v1231_v28 = vadd.f32 %v1221_v23, %v1136_v15  ;;  %v2546_v14 = vmul.f32 -1.442695, %v1227_v9  ;;  %v3751_v62 = vld [vmem:[#allocation5 + $0x40] ss:$16 sps:$4 sm:$0xff]  }
 0x3e9   :  { %2826 = vpow2.f32 %v2542_v16  ;;  %v2543_v40 = vmul.f32 -1.442695, %v1228_v20  ;;  %v3754_v2 = vld [vmem:[#allocation5 + $0x48] ss:$16 sps:$4 sm:$0xff]   ;;  %v3757_v3 = vld [vmem:[#allocation5 + $0x64] ss:$16 sps:$4 sm:$0xff]  }
 0x3ea   :  { %2828 = vpow2.f32 %v2544_v24  ;;  %v2545_v63 = vmul.f32 -1.442695, %v1229_v25  ;;  %v2547_v54 = vmul.f32 -1.442695, %v1231_v28  ;;  %v3760_v7 = vld [vmem:[#allocation5 + $0x6c] ss:$16 sps:$4 sm:$0xff]  }
 0x3eb   :  { %2830 = vpow2.f32 %v2543_v40  ;;  %v3763_v8 = vld [vmem:[#allocation5 + $0x60] ss:$16 sps:$4 sm:$0xff]   ;;  %v3766_v9 = vld [vmem:[#allocation5 + $0x68] ss:$16 sps:$4 sm:$0xff]   ;;  %v3769_v10 = vld [vmem:[#allocation5 + $0x84] ss:$16 sps:$4 sm:$0xff]  }
 0x3ec   :  { %2832 = vpow2.f32 %v2545_v63  ;;  %v3772_v11 = vld [vmem:[#allocation5 + $0x8c] ss:$16 sps:$4 sm:$0xff]   ;;  %v3775_v12 = vld [vmem:[#allocation5 + $0x80] ss:$16 sps:$4 sm:$0xff]   ;;  %v3778_v15 = vld [vmem:[#allocation5 + $0x88] ss:$16 sps:$4 sm:$0xff]  }
 0x3ed   :  { %2834 = vtanh.f32 %v1226_v61  ;;  %v3748_v61 = vld [vmem:[#allocation5 + $0x4c] ss:$16 sps:$4 sm:$0xff]   ;;  %v3781_v16 = vld [vmem:[#allocation5 + $0xa4] ss:$16 sps:$4 sm:$0xff]   ;;  %v3790_v22 = vld [vmem:[#allocation5 + $0xa8] ss:$16 sps:$4 sm:$0xff]  }
 0x3ee   :  { %2836 = vpow2.f32 %v2546_v14  ;;  %v3784_v20 = vld [vmem:[#allocation5 + $0xac] ss:$16 sps:$4 sm:$0xff]   ;;  %v3793_v23 = vld [vmem:[#allocation5 + $0xc4] ss:$16 sps:$4 sm:$0xff]   ;;  %v3799_v25 = vld [vmem:[#allocation5 + $0xc0] ss:$16 sps:$4 sm:$0xff]  }
 0x3ef   :  { %2838 = vtanh.f32 %v1230_v21  ;;  %v3787_v21 = vld [vmem:[#allocation5 + $0xa0] ss:$16 sps:$4 sm:$0xff]   ;;  %v3796_v24 = vld [vmem:[#allocation5 + $0xcc] ss:$16 sps:$4 sm:$0xff]   ;;  %v3802_v28 = vld [vmem:[#allocation5 + $0xc8] ss:$16 sps:$4 sm:$0xff]  }
 0x3f0   :  { %v3805_v40 = vld [vmem:[#allocation5 + $0xe4] ss:$16 sps:$4 sm:$0xff]   ;;  %v3808_v63 = vld [vmem:[#allocation5 + $0xec] ss:$16 sps:$4 sm:$0xff]   ;;  %v3811_v14 = vld [vmem:[#allocation5 + $0xe0] ss:$16 sps:$4 sm:$0xff]  }
 0x3f3   :  { %v2827_v18 = vpop.eup %2826 }
 0x3f4   :  { %v2829_v46 = vpop.eup %2828  ;;  %v1238_v4 = vadd.f32 1.0, %v2827_v18  ;;  %v3814_v18 = vld [vmem:[#allocation5 + $0xe8] ss:$16 sps:$4 sm:$0xff]  }
 0x3f5   :  { %v1250_v30 = vadd.f32 1.0, %v2829_v46  ;;  %v2831_v1 = vpop.eup %2830  ;;  %v4074_v46 = vld [vmem:[#allocation17_spill] sm:$0xff] }
 0x3f6   :  { %2840 = vrcp.f32 %v1238_v4  ;;  %v1239_v33 = vadd.f32 1.0, %v2831_v1  ;;  %v2833_v55 = vpop.eup %2832  ;;  %v1287_v4 = vunpack.c.l.bf16 %v4074_v46 }
 0x3f7   :  { %2842 = vrcp.f32 %v1250_v30  ;;  %v1251_v29 = vadd.f32 1.0, %v2833_v55  ;;  %v2835_v36 = vpop.eup %2834  ;;  %v4076_v55 = vld [vmem:[#allocation19_spill] sm:$0xff] }
 0x3f8   :  { %2844 = vpow2.f32 %v2547_v54  ;;  %v2837_v32 = vpop.eup %2836  ;;  %v4075_v54 = vld [vmem:[#allocation18_spill] sm:$0xff] }
 0x3f9   :  { %2846 = vrcp.f32 %v1239_v33  ;;  %v2839_v42 = vpop.eup %2838  ;;  %v1264_v56 = vadd.f32 1.0, %v2837_v32  ;;  %v1289_v30 = vunpack.c.l.bf16 %v4075_v54 }
 0x3fa   :  { %2848 = vrcp.f32 %v1251_v29  ;;  %v1288_v29 = vunpack.c.l.bf16 %v4076_v55 }
 0x3fb   :  { %2850 = vrcp.f32 %v1264_v56 }
 0x400   :  { %v2841_v31 = vpop.eup %2840 }
 0x401   :  { %v2843_v52 = vpop.eup %2842  ;;  %v1272_v27 = vmul.f32 %v2841_v31, %v2835_v36  ;;  %v4077_v36 = vld [vmem:[#allocation20_spill] sm:$0xff] }
 0x402   :  { %v2845_v13 = vpop.eup %2844  ;;  %v1270_v51 = vmul.f32 %v2843_v52, %v3664_v41  ;;  %v1290_v32 = vunpack.c.l.bf16 %v4077_v36 }
 0x403   :  { %v2847_v19 = vpop.eup %2846  ;;  %v1265_v38 = vadd.f32 1.0, %v2845_v13  ;;  %v1291_v13 = vunpack.c.h.bf16 %v4074_v46 }
 0x404   :  { %v3718_v26 = vadd.f32 %v1272_v27, %v1270_v51  ;;  %v1273_v37 = vmul.f32 %v2847_v19, %v2839_v42  ;;  %v2849_v34 = vpop.eup %2848  ;;  %v1293_v51 = vunpack.c.h.bf16 %v4075_v54 }
 0x405   :  { %v1271_v6 = vmul.f32 %v2849_v34, %v3668_v17  ;;  %v2851_v0 = vpop.eup %2850  ;;  %v3728_v17 = vld [vmem:[#allocation5 + $0x8] ss:$16 sps:$4 sm:$0xff]  }
 0x406   :  { %2852 = vtanh.f32 %v3718_v26 }
 0x407   :  { %v3722_v39 = vadd.f32 %v1273_v37, %v1271_v6  ;;  %2854 = vrcp.f32 %v1265_v38  ;;  %v1292_v38 = vunpack.c.h.bf16 %v4076_v55  ;;  %v1294_v6 = vunpack.c.h.bf16 %v4077_v36 }
 0x409   :  { %2856 = vtanh.f32 %v3722_v39 }
 0x410   :  { %v2853_v35 = vpop.eup %2852 }
 0x411   :  { %v2855_v41 = vpop.eup %2854  ;;  %v1278_v47 = vmul.f32 %v2853_v35, %v2851_v0 }
 0x413   :  { %v2857_v44 = vpop.eup %2856 }
 0x414   :  { %v1279_v48 = vmul.f32 %v2857_v44, %v2855_v41 }
 0x416   :  { %v1295_v49 = vpack.c.bf16 %v1279_v48, %v1278_v47 }
 0x418   :  { %1329 = vmatmul.mubr.bf16.vlgmr.msra.gmra.mrb[44].mxu0 %v1295_v49  ;;  %1372 = vmatmul.mubr.bf16.vlgmr.msra.gmra.mrb[44].mxu1 %v1295_v49 }
 0x419   :  { %1455 = vmatpush1.bf16.msra.mxu0 %v3725_v50  ;;  %1498 = vmatpush1.bf16.msra.mxu1 %v3728_v17 }
 0x41a   :  { %1456 = vmatprep.subr.bf16.mxu0 %v3731_v53  ;;  %1499 = vmatprep.subr.bf16.mxu1 %v3734_v57 }
 0x41b   :  { %1486 = vmatprep.mubr.bf16.mxu0 %v4071_v5  ;;  %1529 = vmatprep.mubr.bf16.mxu1 %v4071_v5 }
 0x41d   :  { %1457 = vmatpush1.bf16.msra.mxu0 %v3739_v58  ;;  %1500 = vmatpush1.bf16.msra.mxu1 %v3742_v59 }
 0x41e   :  { %1458 = vmatprep.subr.bf16.mxu0 %v3745_v60  ;;  %1501 = vmatprep.subr.bf16.mxu1 %v3748_v61 }
 0x421   :  { %1459 = vmatpush1.bf16.msra.mxu0 %v3751_v62  ;;  %1502 = vmatpush1.bf16.msra.mxu1 %v3754_v2 }
 0x422   :  { %1460 = vmatprep.subr.bf16.mxu0 %v3757_v3  ;;  %1503 = vmatprep.subr.bf16.mxu1 %v3760_v7 }
 0x425   :  { %1461 = vmatpush1.bf16.msra.mxu0 %v3763_v8  ;;  %1504 = vmatpush1.bf16.msra.mxu1 %v3766_v9 }
 0x426   :  { %1462 = vmatprep.subr.bf16.mxu0 %v3769_v10  ;;  %1505 = vmatprep.subr.bf16.mxu1 %v3772_v11 }
 0x429   :  { %1463 = vmatpush1.bf16.msra.mxu0 %v3775_v12  ;;  %1506 = vmatpush1.bf16.msra.mxu1 %v3778_v15 }
 0x42a   :  { %1464 = vmatprep.subr.bf16.mxu0 %v3781_v16  ;;  %1507 = vmatprep.subr.bf16.mxu1 %v3784_v20 }
 0x42d   :  { %1465 = vmatpush1.bf16.msra.mxu0 %v3787_v21  ;;  %1508 = vmatpush1.bf16.msra.mxu1 %v3790_v22 }
 0x42e   :  { %1466 = vmatprep.subr.bf16.mxu0 %v3793_v23  ;;  %1509 = vmatprep.subr.bf16.mxu1 %v3796_v24 }
 0x431   :  { %1467 = vmatpush1.bf16.msra.mxu0 %v3799_v25  ;;  %1510 = vmatpush1.bf16.msra.mxu1 %v3802_v28 }
 0x432   :  { %1468 = vmatprep.subr.bf16.mxu0 %v3805_v40  ;;  %1511 = vmatprep.subr.bf16.mxu1 %v3808_v63 }
 0x435   :  { %1469 = vmatpush1.bf16.msra.mxu0 %v3811_v14  ;;  %1512 = vmatpush1.bf16.msra.mxu1 %v3814_v18 }
 0x436   :  { %1612 = vmatprep.subr.bf16.mxu0 %v3703_v43  ;;  %1655 = vmatprep.subr.bf16.mxu1 %v3706_v45 }
 0x4eb   :  { %v1330_v1 = vpop.f32.mrb[44].mxu0  ;;  %v1373_v33 = vpop.f32.mrb[44].mxu1 }
 0x4ec   :  { %v1382_v42 = vadd.f32 %v1330_v1, %v1287_v4  ;;  %v1384_v31 = vadd.f32 %v1373_v33, %v1289_v30  ;;  %v1332_v52 = vpop.f32.mrb[45].mxu0  ;;  %v1375_v27 = vpop.f32.mrb[45].mxu1 }
 0x4ed   :  { %v1383_v19 = vadd.f32 %v1332_v52, %v1288_v29  ;;  %v1385_v56 = vadd.f32 %v1375_v27, %v1290_v32  ;;  %v1334_v37 = vpop.f32.mrb[46].mxu0  ;;  %v1377_v34 = vpop.f32.mrb[46].mxu1 }
 0x4ee   :  { %v2548_v0 = vmul.f32 -1.442695, %v1382_v42  ;;  %v1386_v35 = vadd.f32 %v1334_v37, %v1291_v13  ;;  %v1388_v41 = vadd.f32 %v1377_v34, %v1293_v51  ;;  %v1336_v44 = vpop.f32.mrb[47].mxu0  ;;  %v1379_v47 = vpop.f32.mrb[47].mxu1 }
 0x4ef   :  { %v2550_v48 = vmul.f32 -1.442695, %v1383_v19  ;;  %v1387_v49 = vadd.f32 %v1336_v44, %v1292_v38  ;;  %v1389_v4 = vadd.f32 %v1379_v47, %v1294_v6  ;;  %v2552_v30 = vmul.f32 -1.442695, %v1385_v56 }
 0x4f0   :  { %2858 = vpow2.f32 %v2548_v0  ;;  %v2549_v46 = vmul.f32 -1.442695, %v1386_v35 }
 0x4f1   :  { %2860 = vpow2.f32 %v2550_v48  ;;  %v2551_v54 = vmul.f32 -1.442695, %v1387_v49  ;;  %v2553_v29 = vmul.f32 -1.442695, %v1389_v4 }
 0x4f2   :  { %2862 = vpow2.f32 %v2549_v46 }
 0x4f3   :  { %2864 = vpow2.f32 %v2551_v54 }
 0x4f4   :  { %2866 = vtanh.f32 %v1384_v31 }
 0x4f5   :  { %2868 = vpow2.f32 %v2552_v30 }
 0x4f6   :  { %2870 = vtanh.f32 %v1388_v41 }
 0x4fa   :  { %v2859_v1 = vpop.eup %2858 }
 0x4fb   :  { %v2861_v33 = vpop.eup %2860  ;;  %v1396_v55 = vadd.f32 1.0, %v2859_v1 }
 0x4fc   :  { %v1408_v36 = vadd.f32 1.0, %v2861_v33  ;;  %v2863_v32 = vpop.eup %2862 }
 0x4fd   :  { %2872 = vrcp.f32 %v1396_v55  ;;  %v1397_v42 = vadd.f32 1.0, %v2863_v32  ;;  %v2865_v52 = vpop.eup %2864 }
 0x4fe   :  { %2874 = vrcp.f32 %v1408_v36  ;;  %v1409_v27 = vadd.f32 1.0, %v2865_v52  ;;  %v2867_v13 = vpop.eup %2866  ;;  %v4080_v52 = vld [vmem:[#allocation23_spill] sm:$0xff] }
 0x4ff   :  { %2876 = vpow2.f32 %v2553_v29  ;;  %v2869_v51 = vpop.eup %2868  ;;  %v4079_v29 = vld [vmem:[#allocation22_spill] sm:$0xff] }
 0x500   :  { %2878 = vrcp.f32 %v1397_v42  ;;  %v2871_v19 = vpop.eup %2870  ;;  %v1422_v0 = vadd.f32 1.0, %v2869_v51  ;;  %v1447_v36 = vunpack.c.l.bf16 %v4079_v29 }
 0x501   :  { %2880 = vrcp.f32 %v1409_v27  ;;  %v1446_v27 = vunpack.c.l.bf16 %v4080_v52 }
 0x502   :  { %2882 = vrcp.f32 %v1422_v0 }
 0x507   :  { %v2873_v56 = vpop.eup %2872 }
 0x508   :  { %v2875_v31 = vpop.eup %2874  ;;  %v1430_v37 = vmul.f32 %v2873_v56, %v2867_v13  ;;  %v4081_v13 = vld [vmem:[#allocation24_spill] sm:$0xff] }
 0x509   :  { %v2877_v34 = vpop.eup %2876  ;;  %v1428_v38 = vmul.f32 %v2875_v31, %v3718_v26  ;;  %v1448_v51 = vunpack.c.l.bf16 %v4081_v13 }
 0x50a   :  { %v2879_v6 = vpop.eup %2878  ;;  %v1423_v47 = vadd.f32 1.0, %v2877_v34 }
 0x50b   :  { %v3828_v35 = vadd.f32 %v1430_v37, %v1428_v38  ;;  %v1431_v41 = vmul.f32 %v2879_v6, %v2871_v19  ;;  %v2881_v44 = vpop.eup %2880  ;;  %v1451_v38 = vunpack.c.h.bf16 %v4079_v29 }
 0x50c   :  { %v1429_v48 = vmul.f32 %v2881_v44, %v3722_v39  ;;  %v2883_v4 = vpop.eup %2882  ;;  %v4078_v39 = vld [vmem:[#allocation21_spill] sm:$0xff] }
 0x50d   :  { %2884 = vtanh.f32 %v3828_v35  ;;  %v1445_v55 = vunpack.c.l.bf16 %v4078_v39  ;;  %v1449_v34 = vunpack.c.h.bf16 %v4078_v39 }
 0x50e   :  { %v3832_v49 = vadd.f32 %v1431_v41, %v1429_v48  ;;  %2886 = vrcp.f32 %v1423_v47  ;;  %v1450_v47 = vunpack.c.h.bf16 %v4080_v52  ;;  %v1452_v48 = vunpack.c.h.bf16 %v4081_v13 }
 0x510   :  { %2888 = vtanh.f32 %v3832_v49 }
 0x517   :  { %v2885_v46 = vpop.eup %2884 }
 0x518   :  { %v2887_v26 = vpop.eup %2886  ;;  %v1436_v30 = vmul.f32 %v2885_v46, %v2883_v4 }
 0x51a   :  { %v2889_v54 = vpop.eup %2888 }
 0x51b   :  { %v1437_v1 = vmul.f32 %v2889_v54, %v2887_v26 }
 0x51d   :  { %v1453_v33 = vpack.c.bf16 %v1437_v1, %v1436_v30 }
 0x51f   :  { %1487 = vmatmul.mubr.bf16.vlgmr.msra.gmra.mrb[48].mxu0 %v1453_v33  ;;  %1530 = vmatmul.mubr.bf16.vlgmr.msra.gmra.mrb[48].mxu1 %v1453_v33 }
 0x520   :  { %1613 = vmatpush1.bf16.msra.mxu0 %v3725_v50  ;;  %1656 = vmatpush1.bf16.msra.mxu1 %v3728_v17 }
 0x521   :  { %1614 = vmatprep.subr.bf16.mxu0 %v3731_v53  ;;  %1657 = vmatprep.subr.bf16.mxu1 %v3734_v57 }
 0x522   :  { %1644 = vmatprep.mubr.bf16.mxu0 %v4071_v5  ;;  %1687 = vmatprep.mubr.bf16.mxu1 %v4071_v5 }
 0x524   :  { %1615 = vmatpush1.bf16.msra.mxu0 %v3739_v58  ;;  %1658 = vmatpush1.bf16.msra.mxu1 %v3742_v59 }
 0x525   :  { %1616 = vmatprep.subr.bf16.mxu0 %v3745_v60  ;;  %1659 = vmatprep.subr.bf16.mxu1 %v3748_v61 }
 0x528   :  { %1617 = vmatpush1.bf16.msra.mxu0 %v3751_v62  ;;  %1660 = vmatpush1.bf16.msra.mxu1 %v3754_v2 }
 0x529   :  { %1618 = vmatprep.subr.bf16.mxu0 %v3757_v3  ;;  %1661 = vmatprep.subr.bf16.mxu1 %v3760_v7 }
 0x52c   :  { %1619 = vmatpush1.bf16.msra.mxu0 %v3763_v8  ;;  %1662 = vmatpush1.bf16.msra.mxu1 %v3766_v9 }
 0x52d   :  { %1620 = vmatprep.subr.bf16.mxu0 %v3769_v10  ;;  %1663 = vmatprep.subr.bf16.mxu1 %v3772_v11 }
 0x530   :  { %1621 = vmatpush1.bf16.msra.mxu0 %v3775_v12  ;;  %1664 = vmatpush1.bf16.msra.mxu1 %v3778_v15 }
 0x531   :  { %1622 = vmatprep.subr.bf16.mxu0 %v3781_v16  ;;  %1665 = vmatprep.subr.bf16.mxu1 %v3784_v20 }
 0x534   :  { %1623 = vmatpush1.bf16.msra.mxu0 %v3787_v21  ;;  %1666 = vmatpush1.bf16.msra.mxu1 %v3790_v22 }
 0x535   :  { %1624 = vmatprep.subr.bf16.mxu0 %v3793_v23  ;;  %1667 = vmatprep.subr.bf16.mxu1 %v3796_v24 }
 0x538   :  { %1625 = vmatpush1.bf16.msra.mxu0 %v3799_v25  ;;  %1668 = vmatpush1.bf16.msra.mxu1 %v3802_v28 }
 0x539   :  { %1626 = vmatprep.subr.bf16.mxu0 %v3805_v40  ;;  %1669 = vmatprep.subr.bf16.mxu1 %v3808_v63 }
 0x53c   :  { %1627 = vmatpush1.bf16.msra.mxu0 %v3811_v14  ;;  %1670 = vmatpush1.bf16.msra.mxu1 %v3814_v18 }
 0x53d   :  { %1770 = vmatprep.subr.bf16.mxu0 %v3703_v43  ;;  %1813 = vmatprep.subr.bf16.mxu1 %v3706_v45 }
 0x5f2   :  { %v1488_v32 = vpop.f32.mrb[48].mxu0  ;;  %v1531_v42 = vpop.f32.mrb[48].mxu1 }
 0x5f3   :  { %v1540_v19 = vadd.f32 %v1488_v32, %v1445_v55  ;;  %v1542_v56 = vadd.f32 %v1531_v42, %v1447_v36  ;;  %v1490_v31 = vpop.f32.mrb[49].mxu0  ;;  %v1533_v37 = vpop.f32.mrb[49].mxu1 }
 0x5f4   :  { %v1541_v6 = vadd.f32 %v1490_v31, %v1446_v27  ;;  %v1543_v0 = vadd.f32 %v1533_v37, %v1448_v51  ;;  %v1492_v41 = vpop.f32.mrb[50].mxu0  ;;  %v1535_v44 = vpop.f32.mrb[50].mxu1 }
 0x5f5   :  { %v2554_v4 = vmul.f32 -1.442695, %v1540_v19  ;;  %v1544_v46 = vadd.f32 %v1492_v41, %v1449_v34  ;;  %v1546_v26 = vadd.f32 %v1535_v44, %v1451_v38  ;;  %v1494_v54 = vpop.f32.mrb[51].mxu0  ;;  %v1537_v30 = vpop.f32.mrb[51].mxu1 }
 0x5f6   :  { %v2556_v1 = vmul.f32 -1.442695, %v1541_v6  ;;  %v1545_v33 = vadd.f32 %v1494_v54, %v1450_v47  ;;  %v1547_v55 = vadd.f32 %v1537_v30, %v1452_v48  ;;  %v2558_v36 = vmul.f32 -1.442695, %v1543_v0 }
 0x5f7   :  { %2890 = vpow2.f32 %v2554_v4  ;;  %v2555_v39 = vmul.f32 -1.442695, %v1544_v46 }
 0x5f8   :  { %2892 = vpow2.f32 %v2556_v1  ;;  %v2557_v29 = vmul.f32 -1.442695, %v1545_v33  ;;  %v2559_v27 = vmul.f32 -1.442695, %v1547_v55 }
 0x5f9   :  { %2894 = vpow2.f32 %v2555_v39 }
 0x5fa   :  { %2896 = vpow2.f32 %v2557_v29 }
 0x5fb   :  { %2898 = vtanh.f32 %v1542_v56 }
 0x5fc   :  { %2900 = vpow2.f32 %v2558_v36 }
 0x5fd   :  { %2902 = vtanh.f32 %v1546_v26 }
 0x601   :  { %v2891_v32 = vpop.eup %2890 }
 0x602   :  { %v2893_v42 = vpop.eup %2892  ;;  %v1554_v52 = vadd.f32 1.0, %v2891_v32 }
 0x603   :  { %v1566_v13 = vadd.f32 1.0, %v2893_v42  ;;  %v2895_v51 = vpop.eup %2894 }
 0x604   :  { %2904 = vrcp.f32 %v1554_v52  ;;  %v1555_v19 = vadd.f32 1.0, %v2895_v51  ;;  %v2897_v31 = vpop.eup %2896 }
 0x605   :  { %2906 = vrcp.f32 %v1566_v13  ;;  %v1567_v37 = vadd.f32 1.0, %v2897_v31  ;;  %v2899_v34 = vpop.eup %2898  ;;  %v4084_v31 = vld [vmem:[#allocation27_spill] sm:$0xff] }
 0x606   :  { %2908 = vpow2.f32 %v2559_v27  ;;  %v2901_v38 = vpop.eup %2900  ;;  %v4083_v27 = vld [vmem:[#allocation26_spill] sm:$0xff] }
 0x607   :  { %2910 = vrcp.f32 %v1555_v19  ;;  %v2903_v6 = vpop.eup %2902  ;;  %v1580_v4 = vadd.f32 1.0, %v2901_v38  ;;  %v1605_v13 = vunpack.c.l.bf16 %v4083_v27 }
 0x608   :  { %2912 = vrcp.f32 %v1567_v37  ;;  %v1604_v37 = vunpack.c.l.bf16 %v4084_v31 }
 0x609   :  { %2914 = vrcp.f32 %v1580_v4 }
 0x60e   :  { %v2905_v0 = vpop.eup %2904 }
 0x60f   :  { %v2907_v56 = vpop.eup %2906  ;;  %v1588_v41 = vmul.f32 %v2905_v0, %v2899_v34  ;;  %v4085_v34 = vld [vmem:[#allocation28_spill] sm:$0xff] }
 0x610   :  { %v2909_v44 = vpop.eup %2908  ;;  %v1586_v47 = vmul.f32 %v2907_v56, %v3828_v35  ;;  %v1606_v38 = vunpack.c.l.bf16 %v4085_v34 }
 0x611   :  { %v2911_v48 = vpop.eup %2910  ;;  %v1581_v30 = vadd.f32 1.0, %v2909_v44 }
 0x612   :  { %v3878_v46 = vadd.f32 %v1588_v41, %v1586_v47  ;;  %v1589_v26 = vmul.f32 %v2911_v48, %v2903_v6  ;;  %v2913_v54 = vpop.eup %2912 }
 0x613   :  { %v1587_v1 = vmul.f32 %v2913_v54, %v3832_v49  ;;  %v2915_v55 = vpop.eup %2914  ;;  %v4082_v49 = vld [vmem:[#allocation25_spill] sm:$0xff]  ;;  %v1610_v54 = vunpack.c.h.bf16 %v4085_v34 }
 0x614   :  { %2916 = vtanh.f32 %v3878_v46  ;;  %v1603_v52 = vunpack.c.l.bf16 %v4082_v49  ;;  %v1607_v44 = vunpack.c.h.bf16 %v4082_v49 }
 0x615   :  { %v3882_v33 = vadd.f32 %v1589_v26, %v1587_v1  ;;  %2918 = vrcp.f32 %v1581_v30  ;;  %v1608_v26 = vunpack.c.h.bf16 %v4084_v31 }
 0x617   :  { %2920 = vtanh.f32 %v3882_v33 }
 0x61e   :  { %v2917_v39 = vpop.eup %2916 }
 0x61f   :  { %v2919_v35 = vpop.eup %2918  ;;  %v1594_v36 = vmul.f32 %v2917_v39, %v2915_v55 }
 0x621   :  { %v2921_v29 = vpop.eup %2920 }
 0x622   :  { %v1595_v32 = vmul.f32 %v2921_v29, %v2919_v35 }
 0x624   :  { %v1611_v42 = vpack.c.bf16 %v1595_v32, %v1594_v36 }
 0x626   :  { %1645 = vmatmul.mubr.bf16.vlgmr.msra.gmra.mrb[52].mxu0 %v1611_v42  ;;  %1688 = vmatmul.mubr.bf16.vlgmr.msra.gmra.mrb[52].mxu1 %v1611_v42 }
 0x627   :  { %1771 = vmatpush1.bf16.msra.mxu0 %v3725_v50  ;;  %1814 = vmatpush1.bf16.msra.mxu1 %v3728_v17 }
 0x628   :  { %1772 = vmatprep.subr.bf16.mxu0 %v3731_v53  ;;  %1815 = vmatprep.subr.bf16.mxu1 %v3734_v57 }
 0x629   :  { %1802 = vmatprep.mubr.bf16.mxu0 %v4071_v5  ;;  %1845 = vmatprep.mubr.bf16.mxu1 %v4071_v5 }
 0x62b   :  { %1773 = vmatpush1.bf16.msra.mxu0 %v3739_v58  ;;  %1816 = vmatpush1.bf16.msra.mxu1 %v3742_v59 }
 0x62c   :  { %1774 = vmatprep.subr.bf16.mxu0 %v3745_v60  ;;  %1817 = vmatprep.subr.bf16.mxu1 %v3748_v61 }
 0x62f   :  { %1775 = vmatpush1.bf16.msra.mxu0 %v3751_v62  ;;  %1818 = vmatpush1.bf16.msra.mxu1 %v3754_v2 }
 0x630   :  { %1776 = vmatprep.subr.bf16.mxu0 %v3757_v3  ;;  %1819 = vmatprep.subr.bf16.mxu1 %v3760_v7 }
 0x633   :  { %1777 = vmatpush1.bf16.msra.mxu0 %v3763_v8  ;;  %1820 = vmatpush1.bf16.msra.mxu1 %v3766_v9 }
 0x634   :  { %1778 = vmatprep.subr.bf16.mxu0 %v3769_v10  ;;  %1821 = vmatprep.subr.bf16.mxu1 %v3772_v11 }
 0x637   :  { %1779 = vmatpush1.bf16.msra.mxu0 %v3775_v12  ;;  %1822 = vmatpush1.bf16.msra.mxu1 %v3778_v15 }
 0x638   :  { %1780 = vmatprep.subr.bf16.mxu0 %v3781_v16  ;;  %1823 = vmatprep.subr.bf16.mxu1 %v3784_v20 }
 0x63b   :  { %1781 = vmatpush1.bf16.msra.mxu0 %v3787_v21  ;;  %1824 = vmatpush1.bf16.msra.mxu1 %v3790_v22 }
 0x63c   :  { %1782 = vmatprep.subr.bf16.mxu0 %v3793_v23  ;;  %1825 = vmatprep.subr.bf16.mxu1 %v3796_v24 }
 0x63f   :  { %1783 = vmatpush1.bf16.msra.mxu0 %v3799_v25  ;;  %1826 = vmatpush1.bf16.msra.mxu1 %v3802_v28 }
 0x640   :  { %1784 = vmatprep.subr.bf16.mxu0 %v3805_v40  ;;  %1827 = vmatprep.subr.bf16.mxu1 %v3808_v63 }
 0x643   :  { %1785 = vmatpush1.bf16.msra.mxu0 %v3811_v14  ;;  %1828 = vmatpush1.bf16.msra.mxu1 %v3814_v18 }
 0x644   :  { %1928 = vmatprep.subr.bf16.mxu0 %v3703_v43  ;;  %1971 = vmatprep.subr.bf16.mxu1 %v3706_v45  ;;  %v1609_v43 = vunpack.c.h.bf16 %v4083_v27 }
 0x6f9   :  { %v1646_v51 = vpop.f32.mrb[52].mxu0  ;;  %v1689_v19 = vpop.f32.mrb[52].mxu1 }
 0x6fa   :  { %v1698_v6 = vadd.f32 %v1646_v51, %v1603_v52  ;;  %v1700_v0 = vadd.f32 %v1689_v19, %v1605_v13  ;;  %v1648_v56 = vpop.f32.mrb[53].mxu0  ;;  %v1691_v41 = vpop.f32.mrb[53].mxu1 }
 0x6fb   :  { %v1699_v47 = vadd.f32 %v1648_v56, %v1604_v37  ;;  %v1701_v45 = vadd.f32 %v1691_v41, %v1606_v38  ;;  %v1650_v48 = vpop.f32.mrb[54].mxu0  ;;  %v1693_v4 = vpop.f32.mrb[54].mxu1 }
 0x6fc   :  { %v2560_v30 = vmul.f32 -1.442695, %v1698_v6  ;;  %v1702_v1 = vadd.f32 %v1650_v48, %v1607_v44  ;;  %v1704_v55 = vadd.f32 %v1693_v4, %v1609_v43  ;;  %v1652_v39 = vpop.f32.mrb[55].mxu0  ;;  %v1695_v35 = vpop.f32.mrb[55].mxu1 }
 0x6fd   :  { %v2562_v29 = vmul.f32 -1.442695, %v1699_v47  ;;  %v1703_v36 = vadd.f32 %v1652_v39, %v1608_v26  ;;  %v1705_v32 = vadd.f32 %v1695_v35, %v1610_v54  ;;  %v2564_v52 = vmul.f32 -1.442695, %v1701_v45 }
 0x6fe   :  { %2922 = vpow2.f32 %v2560_v30  ;;  %v2561_v42 = vmul.f32 -1.442695, %v1702_v1 }
 0x6ff   :  { %2924 = vpow2.f32 %v2562_v29  ;;  %v2563_v49 = vmul.f32 -1.442695, %v1703_v36  ;;  %v2565_v19 = vmul.f32 -1.442695, %v1705_v32 }
 0x700   :  { %2926 = vpow2.f32 %v2561_v42 }
 0x701   :  { %2928 = vpow2.f32 %v2563_v49 }
 0x702   :  { %2930 = vtanh.f32 %v1700_v0 }
 0x703   :  { %2932 = vpow2.f32 %v2564_v52 }
 0x704   :  { %2934 = vtanh.f32 %v1704_v55 }
 0x708   :  { %v2923_v27 = vpop.eup %2922 }
 0x709   :  { %v2925_v13 = vpop.eup %2924  ;;  %v1712_v51 = vadd.f32 1.0, %v2923_v27 }
 0x70a   :  { %v1724_v31 = vadd.f32 1.0, %v2925_v13  ;;  %v2927_v37 = vpop.eup %2926 }
 0x70b   :  { %2936 = vrcp.f32 %v1712_v51  ;;  %v1713_v34 = vadd.f32 1.0, %v2927_v37  ;;  %v2929_v38 = vpop.eup %2928 }
 0x70c   :  { %2938 = vrcp.f32 %v1724_v31  ;;  %v1725_v6 = vadd.f32 1.0, %v2929_v38  ;;  %v2931_v56 = vpop.eup %2930 }
 0x70d   :  { %2940 = vpow2.f32 %v2565_v19  ;;  %v2933_v41 = vpop.eup %2932 }
 0x70e   :  { %2942 = vrcp.f32 %v1713_v34  ;;  %v2935_v44 = vpop.eup %2934  ;;  %v1738_v26 = vadd.f32 1.0, %v2933_v41 }
 0x70f   :  { %2944 = vrcp.f32 %v1725_v6 }
 0x710   :  { %2946 = vrcp.f32 %v1738_v26 }
 0x715   :  { %v2937_v43 = vpop.eup %2936 }
 0x716   :  { %v2939_v0 = vpop.eup %2938  ;;  %v1746_v47 = vmul.f32 %v2937_v43, %v2931_v56 }
 0x717   :  { %v2941_v45 = vpop.eup %2940  ;;  %v1744_v48 = vmul.f32 %v2939_v0, %v3878_v46 }
 0x718   :  { %v2943_v4 = vpop.eup %2942  ;;  %v1739_v55 = vadd.f32 1.0, %v2941_v45 }
 0x719   :  { %v3928_v54 = vadd.f32 %v1746_v47, %v1744_v48  ;;  %v1747_v30 = vmul.f32 %v2943_v4, %v2935_v44  ;;  %v2945_v1 = vpop.eup %2944 }
 0x71a   :  { %v1745_v39 = vmul.f32 %v2945_v1, %v3882_v33  ;;  %v2947_v29 = vpop.eup %2946 }
 0x71b   :  { %2948 = vtanh.f32 %v3928_v54 }
 0x71c   :  { %v3932_v35 = vadd.f32 %v1747_v30, %v1745_v39  ;;  %2950 = vrcp.f32 %v1739_v55 }
 0x71e   :  { %2952 = vtanh.f32 %v3932_v35 }
 0x725   :  { %v2949_v36 = vpop.eup %2948 }
 0x726   :  { %v2951_v46 = vpop.eup %2950  ;;  %v1752_v42 = vmul.f32 %v2949_v36, %v2947_v29 }
 0x728   :  { %v2953_v32 = vpop.eup %2952 }
 0x729   :  { %v1753_v49 = vmul.f32 %v2953_v32, %v2951_v46 }
 0x72b   :  { %v1769_v52 = vpack.c.bf16 %v1753_v49, %v1752_v42 }
 0x72d   :  { %1803 = vmatmul.mubr.bf16.vlgmr.msra.gmra.mrb[56].mxu0 %v1769_v52  ;;  %1846 = vmatmul.mubr.bf16.vlgmr.msra.gmra.mrb[56].mxu1 %v1769_v52 }
 0x72e   :  { %1929 = vmatpush1.bf16.msra.mxu0 %v3725_v50  ;;  %1972 = vmatpush1.bf16.msra.mxu1 %v3728_v17  ;;  %v4086_v50 = vld [vmem:[#allocation29_spill] sm:$0xff] }
 0x72f   :  { %1930 = vmatprep.subr.bf16.mxu0 %v3731_v53  ;;  %1973 = vmatprep.subr.bf16.mxu1 %v3734_v57  ;;  %v1761_v17 = vunpack.c.l.bf16 %v4086_v50  ;;  %v4087_v53 = vld [vmem:[#allocation30_spill] sm:$0xff] }
 0x730   :  { %1960 = vmatprep.mubr.bf16.mxu0 %v4071_v5  ;;  %2003 = vmatprep.mubr.bf16.mxu1 %v4071_v5  ;;  %v1763_v57 = vunpack.c.l.bf16 %v4087_v53 }
 0x732   :  { %1931 = vmatpush1.bf16.msra.mxu0 %v3739_v58  ;;  %1974 = vmatpush1.bf16.msra.mxu1 %v3742_v59 }
 0x733   :  { %1932 = vmatprep.subr.bf16.mxu0 %v3745_v60  ;;  %1975 = vmatprep.subr.bf16.mxu1 %v3748_v61  ;;  %v4088_v60 = vld [vmem:[#allocation31_spill] sm:$0xff] }
 0x734   :  { %v1762_v61 = vunpack.c.l.bf16 %v4088_v60 }
 0x736   :  { %1933 = vmatpush1.bf16.msra.mxu0 %v3751_v62  ;;  %1976 = vmatpush1.bf16.msra.mxu1 %v3754_v2  ;;  %v4089_v62 = vld [vmem:[#allocation32_spill] sm:$0xff] }
 0x737   :  { %1934 = vmatprep.subr.bf16.mxu0 %v3757_v3  ;;  %1977 = vmatprep.subr.bf16.mxu1 %v3760_v7  ;;  %v1764_v2 = vunpack.c.l.bf16 %v4089_v62 }
 0x73a   :  { %1935 = vmatpush1.bf16.msra.mxu0 %v3763_v8  ;;  %1978 = vmatpush1.bf16.msra.mxu1 %v3766_v9 }
 0x73b   :  { %1936 = vmatprep.subr.bf16.mxu0 %v3769_v10  ;;  %1979 = vmatprep.subr.bf16.mxu1 %v3772_v11  ;;  %v1765_v10 = vunpack.c.h.bf16 %v4086_v50  ;;  %v1767_v11 = vunpack.c.h.bf16 %v4087_v53 }
 0x73e   :  { %1937 = vmatpush1.bf16.msra.mxu0 %v3775_v12  ;;  %1980 = vmatpush1.bf16.msra.mxu1 %v3778_v15 }
 0x73f   :  { %1938 = vmatprep.subr.bf16.mxu0 %v3781_v16  ;;  %1981 = vmatprep.subr.bf16.mxu1 %v3784_v20 }
 0x742   :  { %1939 = vmatpush1.bf16.msra.mxu0 %v3787_v21  ;;  %1982 = vmatpush1.bf16.msra.mxu1 %v3790_v22  ;;  %v1766_v21 = vunpack.c.h.bf16 %v4088_v60  ;;  %v1768_v22 = vunpack.c.h.bf16 %v4089_v62  ;;  %v2730_v60 = vld [vmem:[#allocation8 + $0x24] ss:$8 sps:$4 sm:$0xff]   ;;  %v2733_v62 = vld [vmem:[#allocation8 + $0x34] ss:$8 sps:$4 sm:$0xff]  }
 0x743   :  { %1940 = vmatprep.subr.bf16.mxu0 %v3793_v23  ;;  %1983 = vmatprep.subr.bf16.mxu1 %v3796_v24 }
 0x746   :  { %1941 = vmatpush1.bf16.msra.mxu0 %v3799_v25  ;;  %1984 = vmatpush1.bf16.msra.mxu1 %v3802_v28 }
 0x747   :  { %1942 = vmatprep.subr.bf16.mxu0 %v3805_v40  ;;  %1985 = vmatprep.subr.bf16.mxu1 %v3808_v63 }
 0x74a   :  { %1943 = vmatpush1.bf16.msra.mxu0 %v3811_v14  ;;  %1986 = vmatpush1.bf16.msra.mxu1 %v3814_v18 }
 0x800   :  { %v1804_v58 = vpop.f32.mrb[56].mxu0  ;;  %v1847_v59 = vpop.f32.mrb[56].mxu1 }
 0x801   :  { %v1856_v3 = vadd.f32 %v1804_v58, %v1761_v17  ;;  %v1858_v7 = vadd.f32 %v1847_v59, %v1763_v57  ;;  %v1806_v8 = vpop.f32.mrb[57].mxu0  ;;  %v1849_v9 = vpop.f32.mrb[57].mxu1  ;;  %v2722_v57 = vld [vmem:[#allocation8] ss:$8 sps:$4 sm:$0xff]   ;;  %v2727_v58 = vld [vmem:[#allocation8 + $0x14] ss:$8 sps:$4 sm:$0xff]  }
 0x802   :  { %v1857_v12 = vadd.f32 %v1806_v8, %v1762_v61  ;;  %v1859_v15 = vadd.f32 %v1849_v9, %v1764_v2  ;;  %v1808_v16 = vpop.f32.mrb[58].mxu0  ;;  %v1851_v20 = vpop.f32.mrb[58].mxu1  ;;  %v2725_v59 = vld [vmem:[#allocation8 + $0x10] ss:$8 sps:$4 sm:$0xff]   ;;  %v2728_v61 = vld [vmem:[#allocation8 + $0x20] ss:$8 sps:$4 sm:$0xff]  }
 0x803   :  { %v2566_v23 = vmul.f32 -1.442695, %v1856_v3  ;;  %v1860_v24 = vadd.f32 %v1808_v16, %v1765_v10  ;;  %v1862_v25 = vadd.f32 %v1851_v20, %v1767_v11  ;;  %v1810_v28 = vpop.f32.mrb[59].mxu0  ;;  %v1853_v40 = vpop.f32.mrb[59].mxu1  ;;  %v2731_v2 = vld [vmem:[#allocation8 + $0x30] ss:$8 sps:$4 sm:$0xff]  }
 0x804   :  { %v2568_v63 = vmul.f32 -1.442695, %v1857_v12  ;;  %v1861_v14 = vadd.f32 %v1810_v28, %v1766_v21  ;;  %v1863_v18 = vadd.f32 %v1853_v40, %v1768_v22  ;;  %v2570_v13 = vmul.f32 -1.442695, %v1859_v15  ;;  %v2736_v3 = vld [vmem:[#allocation8 + $0x44] ss:$8 sps:$4 sm:$0xff]  }
 0x805   :  { %2954 = vpow2.f32 %v2566_v23  ;;  %v2567_v33 = vmul.f32 -1.442695, %v1860_v24  ;;  %v2739_v8 = vld [vmem:[#allocation8 + $0x54] ss:$8 sps:$4 sm:$0xff]   ;;  %v2742_v9 = vld [vmem:[#allocation8 + $0x64] ss:$8 sps:$4 sm:$0xff]  }
 0x806   :  { %2956 = vpow2.f32 %v2568_v63  ;;  %v2569_v27 = vmul.f32 -1.442695, %v1861_v14  ;;  %v2571_v37 = vmul.f32 -1.442695, %v1863_v18  ;;  %v2740_v10 = vld [vmem:[#allocation8 + $0x60] ss:$8 sps:$4 sm:$0xff]  }
 0x807   :  { %2958 = vpow2.f32 %v2567_v33  ;;  %v2745_v11 = vld [vmem:[#allocation8 + $0x74] ss:$8 sps:$4 sm:$0xff]   ;;  %v2743_v12 = vld [vmem:[#allocation8 + $0x70] ss:$8 sps:$4 sm:$0xff]   ;;  %v2746_v15 = vld [vmem:[#allocation10 + $0x40] sm:$0xff]  }
 0x808   :  { %2960 = vpow2.f32 %v2569_v27  ;;  %v2747_v16 = vld [vmem:[#allocation10] sm:$0xff]   ;;  %v2748_v20 = vld [vmem:[#allocation10 + $0x48] sm:$0xff]   ;;  %2613 = vmatprep.subr.bf16.mxu1 %v2746_v15  ;;  %v2750_v22 = vld [vmem:[#allocation10 + $0x50] sm:$0xff]  }
 0x809   :  { %2962 = vtanh.f32 %v1858_v7  ;;  %v2734_v7 = vld [vmem:[#allocation8 + $0x40] ss:$8 sps:$4 sm:$0xff]   ;;  %v2751_v23 = vld [vmem:[#allocation10 + $0x10] sm:$0xff]   ;;  %v2752_v24 = vld [vmem:[#allocation10 + $0x58] sm:$0xff]  }
 0x80a   :  { %2964 = vpow2.f32 %v2570_v13  ;;  %v2749_v21 = vld [vmem:[#allocation10 + $0x8] sm:$0xff]   ;;  %v2754_v28 = vld [vmem:[#allocation10 + $0x60] sm:$0xff]  }
 0x80b   :  { %2966 = vtanh.f32 %v1862_v25  ;;  %v2753_v25 = vld [vmem:[#allocation10 + $0x18] sm:$0xff]   ;;  %v2755_v40 = vld [vmem:[#allocation10 + $0x20] sm:$0xff]   ;;  %v2756_v63 = vld [vmem:[#allocation10 + $0x68] sm:$0xff]  }
 0x80c   :  { %v4090_v14 = vld [vmem:[#allocation33_spill] sm:$0xff]  ;;  %v4091_v33 = vld [vmem:[#allocation34_spill] sm:$0xff] }
 0x80d   :  { %v1919_v18 = vunpack.c.l.bf16 %v4090_v14  ;;  %v1921_v27 = vunpack.c.l.bf16 %v4091_v33 }
 0x80f   :  { %v2955_v51 = vpop.eup %2954 }
 0x810   :  { %v2957_v19 = vpop.eup %2956  ;;  %v1870_v31 = vadd.f32 1.0, %v2955_v51 }
 0x811   :  { %v1882_v34 = vadd.f32 1.0, %v2957_v19  ;;  %v2959_v38 = vpop.eup %2958  ;;  %v4092_v19 = vld [vmem:[#allocation35_spill] sm:$0xff] }
 0x812   :  { %2968 = vrcp.f32 %v1870_v31  ;;  %v1871_v6 = vadd.f32 1.0, %v2959_v38  ;;  %v2961_v56 = vpop.eup %2960  ;;  %v1920_v31 = vunpack.c.l.bf16 %v4092_v19 }
 0x813   :  { %2970 = vrcp.f32 %v1882_v34  ;;  %v1883_v41 = vadd.f32 1.0, %v2961_v56  ;;  %v2963_v44 = vpop.eup %2962 }
 0x814   :  { %2972 = vpow2.f32 %v2571_v37  ;;  %v2965_v43 = vpop.eup %2964  ;;  %v4093_v37 = vld [vmem:[#allocation36_spill] sm:$0xff] }
 0x815   :  { %2974 = vrcp.f32 %v1871_v6  ;;  %v2967_v0 = vpop.eup %2966  ;;  %v1896_v1 = vadd.f32 1.0, %v2965_v43  ;;  %v1922_v34 = vunpack.c.l.bf16 %v4093_v37  ;;  %v1925_v43 = vunpack.c.h.bf16 %v4091_v33 }
 0x816   :  { %2976 = vrcp.f32 %v1883_v41 }
 0x817   :  { %2978 = vrcp.f32 %v1896_v1 }
 0x81c   :  { %v2969_v47 = vpop.eup %2968 }
 0x81d   :  { %v2971_v45 = vpop.eup %2970  ;;  %v1904_v48 = vmul.f32 %v2969_v47, %v2963_v44  ;;  %v1923_v44 = vunpack.c.h.bf16 %v4090_v14 }
 0x81e   :  { %v2973_v4 = vpop.eup %2972  ;;  %v1902_v26 = vmul.f32 %v2971_v45, %v3928_v54 }
 0x81f   :  { %v2975_v30 = vpop.eup %2974  ;;  %v1897_v36 = vadd.f32 1.0, %v2973_v4  ;;  %v1924_v4 = vunpack.c.h.bf16 %v4092_v19  ;;  %v2761_v19 = vld [vmem:[#allocation10 + $0x38] sm:$0xff]  }
 0x820   :  { %v3976_v55 = vadd.f32 %v1904_v48, %v1902_v26  ;;  %v1905_v39 = vmul.f32 %v2975_v30, %v2967_v0  ;;  %v2977_v29 = vpop.eup %2976  ;;  %v1926_v26 = vunpack.c.h.bf16 %v4093_v37 }
 0x821   :  { %v1903_v46 = vmul.f32 %v2977_v29, %v3932_v35  ;;  %v2979_v42 = vpop.eup %2978  ;;  %v2724_v35 = vld [vmem:[#allocation8 + $0x4] ss:$8 sps:$4 sm:$0xff]  }
 0x822   :  { %2980 = vtanh.f32 %v3976_v55  ;;  %2186 = vmatprep.subr.bf16.mxu0 %v2724_v35 }
 0x823   :  { %v3980_v32 = vadd.f32 %v1905_v39, %v1903_v46  ;;  %2982 = vrcp.f32 %v1897_v36 }
 0x825   :  { %2984 = vtanh.f32 %v3980_v32 }
 0x82c   :  { %v2981_v49 = vpop.eup %2980 }
 0x82d   :  { %v2983_v54 = vpop.eup %2982  ;;  %v1910_v50 = vmul.f32 %v2981_v49, %v2979_v42 }
 0x82f   :  { %v2985_v52 = vpop.eup %2984 }
 0x830   :  { %v1911_v17 = vmul.f32 %v2985_v52, %v2983_v54 }
 0x832   :  { %v1927_v53 = vpack.c.bf16 %v1911_v17, %v1910_v50 }
 0x834   :  { %1961 = vmatmul.mubr.bf16.vlgmr.msra.gmra.mrb[60].mxu0 %v1927_v53  ;;  %2004 = vmatmul.mubr.bf16.vlgmr.msra.gmra.mrb[60].mxu1 %v1927_v53 }
 0x835   :  { %2218 = vmatprep.mubr.bf16.mxu0 %v4071_v5  ;;  %2187 = vmatpush1.bf16.msra.mxu0 %v2722_v57  ;;  %v2737_v5 = vld [vmem:[#allocation8 + $0x50] ss:$8 sps:$4 sm:$0xff]  }
 0x836   :  { %2188 = vmatprep.subr.bf16.mxu0 %v2727_v58  ;;  %2614 = vmatpush3.bf16.msra.mxu1 %v2747_v16 }
 0x837   :  { %2615 = vmatprep.subr.bf16.mxu1 %v2748_v20 }
 0x839   :  { %2189 = vmatpush1.bf16.msra.mxu0 %v2725_v59 }
 0x83a   :  { %2190 = vmatprep.subr.bf16.mxu0 %v2730_v60  ;;  %2616 = vmatpush3.bf16.msra.mxu1 %v2749_v21 }
 0x83b   :  { %2617 = vmatprep.subr.bf16.mxu1 %v2750_v22 }
 0x83d   :  { %2191 = vmatpush1.bf16.msra.mxu0 %v2728_v61 }
 0x83e   :  { %2192 = vmatprep.subr.bf16.mxu0 %v2733_v62  ;;  %2618 = vmatpush3.bf16.msra.mxu1 %v2751_v23 }
 0x83f   :  { %2619 = vmatprep.subr.bf16.mxu1 %v2752_v24 }
 0x841   :  { %2193 = vmatpush1.bf16.msra.mxu0 %v2731_v2 }
 0x842   :  { %2194 = vmatprep.subr.bf16.mxu0 %v2736_v3  ;;  %2620 = vmatpush3.bf16.msra.mxu1 %v2753_v25 }
 0x843   :  { %2621 = vmatprep.subr.bf16.mxu1 %v2754_v28 }
 0x845   :  { %2195 = vmatpush1.bf16.msra.mxu0 %v2734_v7 }
 0x846   :  { %2196 = vmatprep.subr.bf16.mxu0 %v2739_v8  ;;  %2622 = vmatpush3.bf16.msra.mxu1 %v2755_v40 }
 0x847   :  { %2623 = vmatprep.subr.bf16.mxu1 %v2756_v63 }
 0x849   :  { %2197 = vmatpush1.bf16.msra.mxu0 %v2737_v5 }
 0x84a   :  { %2198 = vmatprep.subr.bf16.mxu0 %v2742_v9 }
 0x84d   :  { %2199 = vmatpush1.bf16.msra.mxu0 %v2740_v10 }
 0x84e   :  { %2200 = vmatprep.subr.bf16.mxu0 %v2745_v11 }
 0x851   :  { %2201 = vmatpush1.bf16.msra.mxu0 %v2743_v12 }
 0x907   :  { %v1962_v13 = vpop.f32.mrb[60].mxu0  ;;  %v2005_v51 = vpop.f32.mrb[60].mxu1 }
 0x908   :  { %v2014_v38 = vadd.f32 %v1962_v13, %v1919_v18  ;;  %v2016_v6 = vadd.f32 %v2005_v51, %v1921_v27  ;;  %v1964_v56 = vpop.f32.mrb[61].mxu0  ;;  %v2007_v41 = vpop.f32.mrb[61].mxu1  ;;  %v2758_v27 = vld [vmem:[#allocation10 + $0x70] sm:$0xff]   ;;  %v2760_v51 = vld [vmem:[#allocation10 + $0x78] sm:$0xff]  }
 0x909   :  { %v2015_v0 = vadd.f32 %v1964_v56, %v1920_v31  ;;  %v2017_v47 = vadd.f32 %v2007_v41, %v1922_v34  ;;  %v1966_v45 = vpop.f32.mrb[62].mxu0  ;;  %v2009_v48 = vpop.f32.mrb[62].mxu1  ;;  %v2759_v13 = vld [vmem:[#allocation10 + $0x30] sm:$0xff]   ;;  %v2094_v34 = vld [vmem:[%s4020_s4] sm:$0x3] }
 0x90a   :  { %v2572_v30 = vmul.f32 -1.442695, %v2014_v38  ;;  %v2018_v1 = vadd.f32 %v1966_v45, %v1923_v44  ;;  %v2020_v39 = vadd.f32 %v2009_v48, %v1925_v43  ;;  %v1968_v29 = vpop.f32.mrb[63].mxu0  ;;  %v2011_v36 = vpop.f32.mrb[63].mxu1 }
 0x90b   :  { %v2574_v46 = vmul.f32 -1.442695, %v2015_v0  ;;  %v2019_v42 = vadd.f32 %v1968_v29, %v1924_v4  ;;  %v2021_v49 = vadd.f32 %v2011_v36, %v1926_v26  ;;  %v2576_v50 = vmul.f32 -1.442695, %v2017_v47 }
 0x90c   :  { %2986 = vpow2.f32 %v2572_v30  ;;  %v2573_v54 = vmul.f32 -1.442695, %v2018_v1 }
 0x90d   :  { %2988 = vpow2.f32 %v2574_v46  ;;  %v2575_v52 = vmul.f32 -1.442695, %v2019_v42  ;;  %v2577_v57 = vmul.f32 -1.442695, %v2021_v49  ;;  %v2594_v42 = vld [vmem:[%s4022_s6] ss:$0 sm:$0xff] }
 0x90e   :  { %2990 = vpow2.f32 %v2573_v54  ;;  %s3124_s6 = scalar_lea.vmem %s2431_s15, 256 }
 0x90f   :  { %2992 = vpow2.f32 %v2575_v52  ;;  %p3125_p10 = scmp.ne.s32.totalorder %s2431_s15, %s3124_s6  ;;  %p3130_p12 = scmp.lt.s32.totalorder %s3124_s6, %s3124_s6 }
 0x910   :  { %2994 = vtanh.f32 %v2016_v6 }
 0x911   :  { %2996 = vpow2.f32 %v2576_v50  ;;  %p3131_p13 = por %p3130_p12, %p3129_p11 }
 0x912   :  { %2998 = vtanh.f32 %v2020_v39 }
 0x913   :  { %p3132_p0 = pnand %p3131_p13, %p3125_p10 }
 0x916   :  { %v2987_v17 = vpop.eup %2986 }
 0x917   :  { %v2989_v53 = vpop.eup %2988  ;;  %v2028_v35 = vadd.f32 1.0, %v2987_v17 }
 0x918   :  { %v2040_v58 = vadd.f32 1.0, %v2989_v53  ;;  %v2991_v59 = vpop.eup %2990 }
 0x919   :  { %3000 = vrcp.f32 %v2028_v35  ;;  %v2029_v60 = vadd.f32 1.0, %v2991_v59  ;;  %v2993_v61 = vpop.eup %2992 }
 0x91a   :  { %3002 = vrcp.f32 %v2040_v58  ;;  %v2041_v62 = vadd.f32 1.0, %v2993_v61  ;;  %v2995_v2 = vpop.eup %2994 }
 0x91b   :  { %3004 = vpow2.f32 %v2577_v57  ;;  %v2997_v3 = vpop.eup %2996 }
 0x91c   :  { %3006 = vrcp.f32 %v2029_v60  ;;  %v2999_v7 = vpop.eup %2998  ;;  %v2054_v10 = vadd.f32 1.0, %v2997_v3 }
 0x91d   :  { %3008 = vrcp.f32 %v2041_v62 }
 0x91e   :  { %3010 = vrcp.f32 %v2054_v10 }
 0x923   :  { %v3001_v8 = vpop.eup %3000 }
 0x924   :  { %v3003_v5 = vpop.eup %3002  ;;  %v2062_v9 = vmul.f32 %v3001_v8, %v2995_v2 }
 0x925   :  { %v3005_v11 = vpop.eup %3004  ;;  %v2060_v12 = vmul.f32 %v3003_v5, %v3976_v55  ;;  %v2757_v55 = vld [vmem:[#allocation10 + $0x28] sm:$0xff]  }
 0x926   :  { %v3007_v15 = vpop.eup %3006  ;;  %v2055_v22 = vadd.f32 1.0, %v3005_v11  ;;  %2624 = vmatpush3.bf16.msra.mxu1 %v2757_v55 }
 0x927   :  { %v2064_v16 = vadd.f32 %v2062_v9, %v2060_v12  ;;  %v2063_v20 = vmul.f32 %v3007_v15, %v2999_v7  ;;  %v3009_v21 = vpop.eup %3008  ;;  %2625 = vmatprep.subr.bf16.mxu1 %v2758_v27 }
 0x928   :  { %v2061_v23 = vmul.f32 %v3009_v21, %v3980_v32  ;;  %v3011_v25 = vpop.eup %3010  ;;  %v4094_v32 = vlaneseq }
 0x929   :  { %3012 = vtanh.f32 %v2064_v16 }
 0x92a   :  { %v2065_v24 = vadd.f32 %v2063_v20, %v2061_v23  ;;  %3014 = vrcp.f32 %v2055_v22  ;;  %2626 = vmatpush3.bf16.msra.mxu1 %v2759_v13  ;;  %v2097_v31 = vshrl.u32 %v4094_v32, 7 }
 0x92b   :  { %2627 = vmatprep.subr.bf16.mxu1 %v2760_v51 }
 0x92c   :  { %3016 = vtanh.f32 %v2065_v24  ;;  %v2098_v37 = vsub.s32 0, %v2097_v31  ;;  %v2102_v38 = vsub.s32 1, %v2097_v31 }
 0x92e   :  { %2628 = vmatpush3.bf16.msra.mxu1 %v2761_v19  ;;  %v2099_v6 = vrot.slane %v2094_v34, %v2098_v37  ;;  %v2103_v56 = vrot.slane %v2094_v34, %v2102_v38 }
 0x933   :  { %v3013_v28 = vpop.eup %3012 }
 0x934   :  { %v2068_v40 = vmul.f32 %v3013_v28, %v3011_v25  ;;  %v3015_v63 = vpop.eup %3014 }
 0x936   :  { %v3017_v14 = vpop.eup %3016 }
 0x937   :  { %v2069_v18 = vmul.f32 %v3017_v14, %v3015_v63 }
 0x939   :  { %v2077_v33 = vpack.c.bf16 %v2069_v18, %v2068_v40 }
 0x93b   :  { %2219 = vmatmul.mubr.bf16.vlgmr.msra.gmra.mrb[64].mxu0 %v2077_v33 }
 0xa0e   :  { %v2220_v41 = vpop.f32.mrb[64].mxu0 }
 0xa0f   :  { %v2221_v44 = vadd.f32 %v2220_v41, %v2099_v6  ;;  %v2222_v43 = vpop.f32.mrb[65].mxu0 }
 0xa10   :  { %v2223_v0 = vadd.f32 %v2222_v43, %v2103_v56  ;;  %v2224_v47 = vpop.f32.mrb[66].mxu0 }
 0xa11   :  { %v2225_v45 = vadd.f32 %v2224_v47, %v2099_v6  ;;  %v2226_v48 = vpop.f32.mrb[67].mxu0  ;;  %v2229_v26 = vmax.f32 %v2221_v44, 0.0 }
 0xa12   :  { %v2227_v4 = vadd.f32 %v2226_v48, %v2103_v56  ;;  %v2230_v1 = vmax.f32 %v2223_v0, 0.0 }
 0xa13   :  { %v2231_v30 = vmax.f32 %v2225_v45, 0.0 }
 0xa14   :  { %v2232_v39 = vmax.f32 %v2227_v4, 0.0 }
 0xa15   :  { %v2233_v29 = vpack.c.bf16 %v2231_v30, %v2229_v26 }
 0xa16   :  { %v2234_v36 = vpack.c.bf16 %v2232_v39, %v2230_v1 }
 0xa18   :  { %2402 = vmatprep.mubr.bf16.mxu1 %v2234_v36 }
 0xa19   :  { %2403 = vmatmul.mubr.bf16.vlgmr.msra.gmra.mrb[64].mxu1 %v2233_v29 }
 0xaec   :  { %v2629_v46 = vpop.f32.mrb[64].mxu1 }
 0xaed   :  { %v2630_v49 = vpop.f32.mrb[65].mxu1 }
 0xaee   :  { %v2631_v54 = vadd.f32 %v2630_v49, %v2629_v46  ;;  %v2632_v52 = vpop.f32.mrb[66].mxu1 }
 0xaef   :  { %v2633_v50 = vpop.f32.mrb[67].mxu1 }
 0xaf0   :  { %v2405_v17 = vadd.f32 %v2631_v54, %v2594_v42  ;;  %v2634_v53 = vadd.f32 %v2633_v50, %v2632_v52 }
 0xaf2   :  { %v2611_v35 = vmul.f32 -1.442695, %v2405_v17  ;;  %v2408_v57 = vadd.f32 %v2634_v53, %v2594_v42 }
 0xaf4   :  { %3018 = vpow2.f32 %v2611_v35  ;;  %v2612_v58 = vmul.f32 -1.442695, %v2408_v57 }
 0xaf6   :  { %3020 = vpow2.f32 %v2612_v58 }
 0xafe   :  { %v3019_v59 = vpop.eup %3018 }
 0xaff   :  { %v2417_v60 = vadd.f32 1.0, %v3019_v59 }
 0xb00   :  { %v3021_v61 = vpop.eup %3020 }
 0xb01   :  { %3022 = vrcp.f32 %v2417_v60  ;;  %v2418_v62 = vadd.f32 1.0, %v3021_v61 }
 0xb03   :  { %3024 = vrcp.f32 %v2418_v62 }
 0xb0b   :  { %v3023_v2 = vpop.eup %3022 }
 0xb0c   :  { %2423 = vst [vmem:[#allocation11] sm:$0xff] %v3023_v2 }
 0xb0d   :  { %v3025_v3 = vpop.eup %3024 }
 0xb0e   :  { %2424 = vst [vmem:[#allocation11 + $0x8] sm:$0xff] %v3025_v3 }
 0xb0f   :  { %3135 = shalt.err (!%p3132_p0)
}
 0xb10   :  { %s3136_s16 = scalar_lea.hbm %s4023_s7, 256 }
 0xb11   :  { %p3137_p1 = scmp.ne.s32.totalorder %s4023_s7, %s3136_s16  ;;  %p3140_p2 = scmp.lt.u32.totalorder %s3136_s16, %s4023_s7 }
 0xb13   :  { %p3142_p3 = pnand %p3140_p2, %p3137_p1 }
 0xb15   :  { %3145 = shalt.err (!%p3142_p3)
}
 0xb16   :  { %2436 = dma.vmem_to_hbm [thread:$0]  %s2431_s15, 256, %s4023_s7, [#allocation7], %s3153_s11, %s3153_s11, %s3154_s12  }
 0xb17   :  { %3150 = dma.done.wait [#allocation7], 256  }
 0xb18   :  { %3151 = vsyncadd [#allocation7], 4294967040 }
 0xb19   :  { %2440 = vsyncpa [#allocation6], 1 }
 0xb1a   :  { %2441 = vsyncpa [#allocation9], 1 }
 0xb1b   :  { %2442 = vsyncpa [#allocation7], 1 }

</bundles_post_ra>
